<compile_context>
chip_gen: v7x
topology: tpu7x:2x2x1
jax: 0.10.0
libtpu: 0.0.40
codegen_flags: <defaults>
</compile_context>

<pallas_src>
import functools
import math

import jax
import jax.numpy as jnp
from jax.experimental import pallas as pl
from jax.experimental.pallas import tpu as pltpu


def _sincos_kernel(i_ref, o_ref):
    """Fill one (tile_h, w, E) tile of the (h, w, E) sin/cos table."""
    tile_h, w, embed_dim = o_ref.shape
    d4 = embed_dim // 4
    d2 = embed_dim // 2
    f32 = jnp.float32

    # omega[k] = 10000**(-k/d4): one exp per column (EUP slot), shape (1, 1, d4).
    k = jax.lax.broadcasted_iota(jnp.int32, (1, 1, d4), 2).astype(f32)
    omega = jnp.exp(k * f32(-math.log(10000.0) / d4))

    # j-dependent half: only w distinct rows, shape (1, w, 2*d4).
    j = jax.lax.broadcasted_iota(jnp.int32, (1, w, d4), 1).astype(f32)
    ang_j = j * omega
    jslab = jnp.concatenate([jnp.sin(ang_j), jnp.cos(ang_j)], axis=-1)

    # i-dependent half: only tile_h distinct rows in this tile, shape (tile_h, 1, 2*d4).
    ang_i = i_ref[...] * omega            # (tile_h,1,1) * (1,1,d4) -> (tile_h,1,d4)
    islab = jnp.concatenate([jnp.sin(ang_i), jnp.cos(ang_i)], axis=-1)

    # Row-replicate via broadcasts; two half-width lane-dense stores (offsets 0, E/2).
    o_ref[:, :, :d2] = jnp.broadcast_to(jslab, (tile_h, w, d2))
    o_ref[:, :, d2:] = jnp.broadcast_to(islab, (tile_h, w, d2))


@functools.lru_cache(maxsize=None)
def sincos_pos_embed(h: int, w: int, embed_dim: int, cls_token: bool = False):
    assert embed_dim % 2 == 0, embed_dim
    assert embed_dim % 4 == 0, "kernel assumes embed_dim divisible by 4 (as in AIM usage)"

    # Grid over the i (grid-row) axis: target ~1 MiB of output per step, at least
    # two (and an even number of) steps so both v7x TensorCores get work and the
    # output writeback DMA pipelines with compute.  tile_h is also capped so the
    # (tile_h, 1, 1) i-values block stays tiny in VMEM.
    bytes_per_i = w * embed_dim * 4
    ns = max(1, pl.cdiv(h * bytes_per_i, 1 << 20))
    ns = max(ns, pl.cdiv(h, 128))
    if h >= 2:
        ns = max(ns, 2)
        ns += ns % 2          # even step count balances the two v7x cores
    ns = min(ns, h)
    tile_h = pl.cdiv(h, ns)
    ns = pl.cdiv(h, tile_h)

    # i values, padded to a whole number of tiles so input blocks never read OOB.
    # The partial last *output* block (when tile_h does not divide h) is clipped by
    # Pallas on writeback.
    i_vals = jnp.arange(ns * tile_h, dtype=jnp.float32).reshape(-1, 1, 1)

    pe = pl.pallas_call(
        _sincos_kernel,
        out_shape=jax.ShapeDtypeStruct((h, w, embed_dim), jnp.float32),
        grid=(ns,),
        in_specs=[pl.BlockSpec((tile_h, 1, 1), lambda t: (t, 0, 0))],
        out_specs=pl.BlockSpec((tile_h, w, embed_dim), lambda t: (t, 0, 0)),
        compiler_params=pltpu.CompilerParams(dimension_semantics=("parallel",)),
    )(i_vals)

    pe = pe.reshape(h * w, embed_dim)   # row-major flatten: matches reference layout
    if cls_token:
        # One-time (memoized) zero-row prepend; kept outside the kernel so every
        # grid step writes a uniform (tile_h, w, E) tile of the separable table.
        pe = jnp.concatenate([jnp.zeros((1, embed_dim), jnp.float32), pe], axis=0)
    return pe


def _ref_sincos_pos_embed(h, w, embed_dim, cls_token):
    """Pure-JAX mirror of the PyTorch reference for correctness checking."""
    def get_1d(d, pos):
        omega = jnp.arange(d // 2, dtype=jnp.float32) / (d / 2.0)
        omega = 1.0 / 10000.0 ** omega
        pos = pos.reshape(-1)
        out = jnp.einsum("m,d->md", pos, omega)
        return jnp.concatenate([jnp.sin(out), jnp.cos(out)], axis=1)

    grid_h = jnp.arange(h, dtype=jnp.float32)
    grid_w = jnp.arange(w, dtype=jnp.float32)
    gw, gh = jnp.meshgrid(grid_w, grid_h, indexing="xy")   # each (h, w)
    emb_h = get_1d(embed_dim // 2, gw)   # uses grid[0] (w-index j), as in torch code
    emb_w = get_1d(embed_dim // 2, gh)   # uses grid[1] (h-index i)
    pe = jnp.concatenate([emb_h, emb_w], axis=1)
    if cls_token:
        pe = jnp.concatenate([jnp.zeros((1, embed_dim), jnp.float32), pe], axis=0)
    return pe


if __name__ == "__main__":
    # The module's forward takes only integer shape args; no tensor inputs.
    _ = jax.random.PRNGKey(0)  # unused: module has no learned params / tensor inputs

    cases = [
        (16, 16, 32, False),
        (16, 16, 32, True),
        (7, 9, 64, True),      # odd sizes: partial last i-tile, w not multiple of 8
    ]
    for h, w, embed_dim, cls_token in cases:
        out = jax.block_until_ready(sincos_pos_embed(h, w, embed_dim, cls_token))
        ref = _ref_sincos_pos_embed(h, w, embed_dim, cls_token)
        n_rows = h * w + (1 if cls_token else 0)
        assert out.shape == ref.shape == (n_rows, embed_dim)
        assert out.dtype == jnp.float32
        err = float(jnp.max(jnp.abs(out - ref)))
        assert err < 1e-5, (
            f"mismatch h={h} w={w} E={embed_dim} cls={cls_token}: max abs err {err}"
        )

    print("KERNEL_OK")
</pallas_src>

<mosaic_0001>
module attributes {stable_mosaic.version = 11 : i64} {
  func.func @_sincos_kernel(%arg0: i32, %arg1: memref<8x1x1xf32, #tpu.memory_space<vmem>>, %arg2: memref<8x16x32xf32, #tpu.memory_space<vmem>>) attributes {dimension_semantics = [#tpu.dimension_semantics<parallel>], iteration_bounds = array<i64: 2>, scalar_prefetch = 0 : i64, scratch_operands = 0 : i64, tpu.core_type = #tpu.core_type<tc>, window_params = [{transform_indices = @transform_0, window_bounds = array<i64: 8, 1, 1>}, {transform_indices = @transform_1, window_bounds = array<i64: 8, 16, 32>}]} {
    %0 = tpu.iota {dimensions = array<i32: 2>} : vector<1x1x8xi32>
    %1 = arith.sitofp %0 : vector<1x1x8xi32> to vector<1x1x8xf32>
    %cst = arith.constant -1.15129256 : f32
    %2 = vector.broadcast %cst : f32 to vector<1x1x8xf32>
    %3 = arith.mulf %1, %2 : vector<1x1x8xf32>
    %4 = math.exp %3 : vector<1x1x8xf32>
    %5 = tpu.iota {dimensions = array<i32: 1>} : vector<1x16x8xi32>
    %6 = arith.sitofp %5 : vector<1x16x8xi32> to vector<1x16x8xf32>
    %7 = vector.broadcast %4 : vector<1x1x8xf32> to vector<1x16x8xf32>
    %8 = arith.mulf %6, %7 : vector<1x16x8xf32>
    %9 = math.sin %8 : vector<1x16x8xf32>
    %10 = math.cos %8 : vector<1x16x8xf32>
    %11 = tpu.concatenate %9, %10 in 2 : vector<1x16x8xf32>, vector<1x16x8xf32> -> vector<1x16x16xf32>
    %c0 = arith.constant 0 : index
    %c0_0 = arith.constant 0 : index
    %c0_1 = arith.constant 0 : index
    %12 = vector.load %arg1[%c0, %c0_0, %c0_1] : memref<8x1x1xf32, #tpu.memory_space<vmem>>, vector<8x1x1xf32>
    %13 = vector.broadcast %12 : vector<8x1x1xf32> to vector<8x1x8xf32>
    %14 = vector.broadcast %4 : vector<1x1x8xf32> to vector<8x1x8xf32>
    %15 = arith.mulf %13, %14 : vector<8x1x8xf32>
    %16 = math.sin %15 : vector<8x1x8xf32>
    %17 = math.cos %15 : vector<8x1x8xf32>
    %18 = tpu.concatenate %16, %17 in 2 : vector<8x1x8xf32>, vector<8x1x8xf32> -> vector<8x1x16xf32>
    %19 = vector.shape_cast %11 : vector<1x16x16xf32> to vector<1x16x16xf32>
    %20 = vector.broadcast %19 : vector<1x16x16xf32> to vector<8x16x16xf32>
    %c0_2 = arith.constant 0 : index
    %c0_3 = arith.constant 0 : index
    %c0_4 = arith.constant 0 : index
    %21 = vector.load %arg2[%c0_2, %c0_3, %c0_4] : memref<8x16x32xf32, #tpu.memory_space<vmem>>, vector<8x16x16xf32>
    tpu.vector_store %arg2[%c0_2, %c0_3, %c0_4], %20 {strides = array<i32>} : memref<8x16x32xf32, #tpu.memory_space<vmem>>, vector<8x16x16xf32>,
    %22 = vector.shape_cast %18 : vector<8x1x16xf32> to vector<8x1x16xf32>
    %23 = vector.broadcast %22 : vector<8x1x16xf32> to vector<8x16x16xf32>
    %c0_5 = arith.constant 0 : index
    %c0_6 = arith.constant 0 : index
    %c16 = arith.constant 16 : index
    %24 = vector.load %arg2[%c0_5, %c0_6, %c16] : memref<8x16x32xf32, #tpu.memory_space<vmem>>, vector<8x16x16xf32>
    tpu.vector_store %arg2[%c0_5, %c0_6, %c16], %23 {strides = array<i32>} : memref<8x16x32xf32, #tpu.memory_space<vmem>>, vector<8x16x16xf32>,
    return
  }
  func.func @transform_0(%arg0: i32) -> (i32, i32, i32) {
    %c0_i32 = arith.constant 0 : i32
    %c0_i32_0 = arith.constant 0 : i32
    %c0_i32_1 = arith.constant 0 : i32
    return %arg0, %c0_i32, %c0_i32_0 : i32, i32, i32
  }
  func.func @transform_1(%arg0: i32) -> (i32, i32, i32) {
    %c0_i32 = arith.constant 0 : i32
    %c0_i32_0 = arith.constant 0 : i32
    %c0_i32_1 = arith.constant 0 : i32
    return %arg0, %c0_i32, %c0_i32_0 : i32, i32, i32
  }
}

</mosaic_0001>

<bundles_post_ra>
// kernel: tpu_custom_call.1
= control target key start
LH: loop header
LB: loop body
LE: loop exit
PB: predicated region body
PF: predicated region fallthrough
CT: control target
= control target key end

     0   :  { %6 = vsyncpa [#allocation3], 0  ;;  %s4245_s0 = inlined_call_operand.vmem [shape: f32[16,1,1], index: 0, kind: input, shape index: {}]   ;;  %s4246_s1 = inlined_call_operand.hbm [shape: f32[16,16,32], index: 1, kind: output, shape index: {}]  }
   0x1   :  { %8 = vsyncpa [#allocation3 + $0x1], 0  ;;  %s2821_s6 = smov 0   ;;  %s2823_s7 = smov 0  }
   0x2   :  { %s2825_s8 = smov 0   ;;  %s2827_s9 = smov 0  }
   0x3 LB: > { %s2842_s10 = sadd.s32 4294967295, %s2798_s9   ;;  %s2509_s11 = sadd.s32 4294967294, %s2798_s9   ;;  %s2798_s9 = sphi %s2827_s9, %s4344_s9   ;;  %s2794_s8 = sphi %s2825_s8, %s4343_s8   ;;  %s2790_s7 = sphi %s2823_s7, %s4342_s7   ;;  %s2786_s6 = sphi %s2821_s6, %s4341_s6  }
   0x4   : > { %s2846_s12 = sadd.s32 1, %s2798_s9   ;;  %s47_s13 = sadd.s32 1, %s2794_s8 }
   0x5   : > { %s44_s14 = ssub.s32 %s2798_s9, %s2846_s12  ;;  %p57_p0 = scmp.ne.s32.totalorder %s2794_s8, %s2790_s7 }
   0x6   : > { %p45_p1 = scmp.eq.s32.totalorder %s44_s14, 0  ;;  %p58_p2 = scmp.eq.s32.totalorder %s2842_s10, 1 }
   0x7   : > { %p63_p3 = scmp.ne.s32.totalorder %s2790_s7, %s2786_s6  ;;  %p64_p4 = scmp.eq.s32.totalorder %s2509_s11, 1 }
   0x8   : > { %s2857_s15 = scalar_select %p45_p1, %s2794_s8, %s47_s13  }
   0x9   : > { %p2859_p5 = por %p58_p2, %p57_p0  ;;  %p2863_p6 = por %p64_p4, %p63_p3 }
   0xa   : > { %p2512_p7 = scmp.ge.s32.totalorder %s2798_s9, 1  ;;  %p90_p8 = scmp.lt.s32.totalorder %s2798_s9, 3 }
   0xc   : > { %p91_p9 = pnand %p2512_p7, %p90_p8 }
   0xe   : > { %94 = sbr.rel (%p91_p9) target bundleno = 656 (0x290), region = 24 }
  0x15   : > { %s2514_s18 = sshll.u32 %s2842_s10, 3  ;;  %v2800_v0 = vmov 0   ;;  %v115_v9 = vlaneseq  ;;  %s2807_s22 = smov 8  }
  0x16   : > { %2693 = vset.pattern.permute.xlu1 %v2800_v0  ;;  %2692 = vset.pattern.permute.xlu0 %v2800_v0  ;;  %p110_p10 = scmp.lt.s32.totalorder %s2514_s18, 15  ;;  %v4249_v0 = vmov 2102212464   ;;  %s2808_s23 = smov 16  }
  0x17   : > { %v116_v10 = vand.u32 127, %v115_v9  ;;  %v2873_v14 = vshrl.u32 %v115_v9, 7  ;;  %s106_s24 = sand.u32 1, %s2790_s7   ;;  %s2602_s27 = sshll.u32 %s2842_s10, 11 }
  0x18   : > { %s4346_s18 = smov (!%p110_p10, %s2514_s18), 15  ;;  %s2513_s25 = sshll.u32 %s106_s24, 7 }
  0x19   : > { %s112_s21 = scalar_lea.vmem %s4245_s0, %s4346_s18  ;;  %v117_v11 = vcvt.s32.f32 %v116_v10  ;;  %4286 = vst [vmem:[#allocation5_spill] sm:$0xff] %v2873_v14  ;;  %v2876_v15 = vsub.s32 0, %v2873_v14  ;;  %s4125_s26 = scalar_lea.vmem [#allocation2], %s2513_s25 }
  0x1a   : > { %v555_v1 = vld [vmem:[%s112_s21 + $0x2] sm:$0x1]  ;;  %v553_v2 = vld [vmem:[%s112_s21] sm:$0x1]  ;;  %v556_v3 = vld [vmem:[%s112_s21 + $0x3] sm:$0x1]  ;;  %s4193_s2 = scalar_lea.hbm %s4246_s1, %s2602_s27 }
  0x1b   : > { %581 = vperm.xlu1 %2693, %v555_v1   ;;  %563 = vperm.xlu0 %2692, %v553_v2   ;;  %v554_v4 = vld [vmem:[%s112_s21 + $0x1] sm:$0x1]  ;;  %v558_v5 = vld [vmem:[%s112_s21 + $0x5] sm:$0x1]  ;;  %v557_v6 = vld [vmem:[%s112_s21 + $0x4] sm:$0x1] }
  0x1c   : > { %v560_v7 = vld [vmem:[%s112_s21 + $0x7] sm:$0x1]  ;;  %v559_v8 = vld [vmem:[%s112_s21 + $0x6] sm:$0x1]  ;;  %v118_v12 = vmul.f32 -1.1512926, %v117_v11 }
  0x1d   : > { %4287 = vst [vmem:[#allocation6_spill] sm:$0xff] %v2876_v15  ;;  %s2450_s28 = sshll.u32 %s4125_s26, 4  ;;  %s4203_s3 = scalar_lea.sflag [#allocation3], %s106_s24  ;;  %s4195_s28 = int_to_ptr.vmem [resolvable:$true] %s2450_s28 }
  0x1e   : > { %v119_v13 = vmul.f32 1.442695, %v118_v12  ;;  %s2736_s4 = scalar_lea.vmem %s4195_s28, 2048  ;;  %s2809_s5 = smov [#allocation2]  }
  0x1f   : > { %590 = vperm.xlu1 %2693, %v556_v3   ;;  %572 = vperm.xlu0 %2692, %v554_v4   ;;  %v4263_v4 = vmov 920167782   ;;  %p2737_p11 = scmp.ne.s32.totalorder %s4195_s28, %s2736_s4  ;;  %s2740_s10 = sshll.u32 %s2809_s5, 4  ;;  %s2741_s10 = int_to_ptr.vmem [resolvable:$false] %s2740_s10 }
  0x20   : > { %2694 = vpow2.f32 %v119_v13  ;;  %s2742_s11 = scalar_lea.vmem %s2741_s10, 4096  ;;  %p2743_p0 = scmp.lt.s32.totalorder %s4195_s28, %s2741_s10 }
  0x21   : > { %p2738_p12 = pnand %p2737_p11, %p2859_p5  ;;  %p2744_p1 = scmp.lt.s32.totalorder %s2742_s11, %s2736_s4 }
  0x23   : > { %608 = vperm.xlu1 %2693, %v558_v5   ;;  %599 = vperm.xlu0 %2692, %v557_v6   ;;  %p2739_p13 = pneg %p2738_p12  ;;  %p2745_p2 = por %p2744_p1, %p2743_p0 }
  0x25   : > { %p2746_p3 = pnand %p2745_p2, %p2739_p13 }
  0x27   : > { %626 = vperm.xlu1 %2693, %v560_v7   ;;  %617 = vperm.xlu0 %2692, %v559_v8   ;;  %v4261_v7 = vmov 1326507024  }
  0x2a   : > { %v2878_v16 = vpop.eup %2694 }
  0x2b   : > { %4288 = vst [vmem:[#allocation7_spill] sm:$0xff] %v2878_v16 }
  0x9a   : > { %v582_v17 = vpop.permute.xlu1 %581  ;;  %v564_v18 = vpop.permute.xlu0 %563 }
  0x9b   : > { %v587_v19 = vrot.slane %v582_v17, %v2876_v15  ;;  %v569_v20 = vrot.slane %v564_v18, %v2876_v15 }
  0x9d   : > { %v2883_v21 = vmul.f32 %v2878_v16, %v587_v19  ;;  %v2886_v22 = vmul.f32 %v2878_v16, %v569_v20 }
  0x9e   : > { %v591_v23 = vpop.permute.xlu1 %590  ;;  %v573_v24 = vpop.permute.xlu0 %572 }
  0x9f   : > { %v852_v25 = vand.u32 2139095040, %v2883_v21  ;;  %v644_v26 = vand.u32 2139095040, %v2886_v22  ;;  %v596_v27 = vrot.slane %v591_v23, %v2876_v15  ;;  %v578_v28 = vrot.slane %v573_v24, %v2876_v15 }
  0xa0   : > { %v4248_v57 = vand.u32 2147483647, %v2886_v22  ;;  %v4247_v12 = vand.u32 2147483647, %v2883_v21 }
  0xa1   : > { %v853_v29 = vshrl.u32 %v852_v25, 23  ;;  %v645_v30 = vshrl.u32 %v644_v26, 23  ;;  %v2893_v31 = vmul.f32 %v2878_v16, %v596_v27  ;;  %v2896_v32 = vmul.f32 %v2878_v16, %v578_v28 }
  0xa2   : > { %v609_v37 = vpop.permute.xlu1 %608  ;;  %v600_v38 = vpop.permute.xlu0 %599  ;;  %v2927_v3 = vand.u32 8388607, %v4248_v57 }
  0xa3   : > { %v2539_v33 = vadd.s32 4294967169, %v853_v29  ;;  %v2531_v34 = vadd.s32 4294967169, %v645_v30  ;;  %v956_v35 = vand.u32 2139095040, %v2893_v31  ;;  %v748_v36 = vand.u32 2139095040, %v2896_v32 }
  0xa4   : > { %v614_v43 = vrot.slane %v609_v37, %v2876_v15  ;;  %v605_v45 = vrot.slane %v600_v38, %v2876_v15  ;;  %v649_v26 = vor.u32 8388608, %v2927_v3  ;;  %v4253_v3 = vmov 2475754826  }
  0xa5   : > { %v859_v39 = vadd.s32 1, %v2539_v33  ;;  %v651_v40 = vadd.s32 1, %v2531_v34  ;;  %v957_v41 = vshrl.u32 %v956_v35, 23  ;;  %v749_v42 = vshrl.u32 %v748_v36, 23 }
  0xa6   : > { %v2903_v50 = vmul.f32 %v2878_v16, %v614_v43  ;;  %v2906_v51 = vmul.f32 %v2878_v16, %v605_v45  ;;  %v627_v20 = vpop.permute.xlu1 %626  ;;  %v618_v25 = vpop.permute.xlu0 %617  ;;  %v2964_v36 = vand.u32 8388607, %v4247_v12 }
  0xa7   : > { %vm860_vm0 = vcmp.gt.s32.totalorder %v859_v39, 0  ;;  %vm652_vm1 = vcmp.gt.s32.totalorder %v651_v40, 0  ;;  %v2543_v44 = vadd.s32 4294967169, %v957_v41  ;;  %v2535_v46 = vadd.s32 4294967169, %v749_v42 }
  0xa8   : > { %v861_v47 = vsel %vm860_vm0, %v859_v39, 0  ;;  %v653_v48 = vsel %vm652_vm1, %v651_v40, 0  ;;  %v1164_v55 = vand.u32 2139095040, %v2903_v50  ;;  %v1060_v56 = vand.u32 2139095040, %v2906_v51 }
  0xa9   : > { %v963_v49 = vadd.s32 1, %v2543_v44  ;;  %v755_v52 = vadd.s32 1, %v2535_v46  ;;  %v2908_v53 = vand.u32 31, %v861_v47  ;;  %v2910_v54 = vand.u32 31, %v653_v48 }
  0xaa   : > { %v1165_v61 = vshrl.u32 %v1164_v55, 23  ;;  %v1061_v63 = vshrl.u32 %v1060_v56, 23  ;;  %v2940_v13 = vshrl.u32 %v861_v47, 5  ;;  %v2946_v23 = vshrl.u32 %v653_v48, 5 }
  0xab   : > { %vm964_vm2 = vcmp.gt.s32.totalorder %v963_v49, 0  ;;  %vm756_vm3 = vcmp.gt.s32.totalorder %v755_v52, 0  ;;  %v2916_v58 = vsub.s32 32, %v2908_v53  ;;  %v2919_v59 = vsub.s32 32, %v2910_v54 }
  0xac   : > { %v965_v60 = vsel %vm964_vm2, %v963_v49, 0  ;;  %v757_v62 = vsel %vm756_vm3, %v755_v52, 0  ;;  %v875_v1 = vshll.u32 %v4249_v0, %v2908_v53  ;;  %v878_v6 = vshll.u32 %v4263_v4, %v2908_v53 }
  0xad   : > { %v2923_v2 = vand.u32 31, %v965_v60  ;;  %v876_v5 = vshrl.u32 %v4263_v4, %v2916_v58  ;;  %v879_v8 = vshrl.u32 %v4261_v7, %v2916_v58  ;;  %v668_v9 = vshrl.u32 %v4263_v4, %v2919_v59 }
  0xae   : > { %v2937_v10 = vand.u32 31, %v757_v62  ;;  %v2551_v11 = vadd.s32 4294967169, %v1165_v61  ;;  %v667_v17 = vshll.u32 %v4249_v0, %v2910_v54  ;;  %v671_v18 = vshrl.u32 %v4261_v7, %v2919_v59 }
  0xaf   : > { %v2547_v19 = vadd.s32 4294967169, %v1061_v63  ;;  %v2949_v24 = vsub.s32 32, %v2923_v2  ;;  %v2952_v27 = vor.u32 %v876_v5, %v875_v1  ;;  %v880_v28 = vor.u32 %v879_v8, %v878_v6 }
  0xb0   : > { %v2954_v29 = vor.u32 %v668_v9, %v667_v17  ;;  %v670_v30 = vshll.u32 %v4263_v4, %v2910_v54  ;;  %v2959_v33 = vsub.s32 32, %v2937_v10  ;;  %v1171_v34 = vadd.s32 1, %v2551_v11 }
  0xb1   : > { %v632_v35 = vrot.slane %v627_v20, %v2876_v15  ;;  %vm884_vm4 = vcmp.lt.s32.totalorder %v2940_v13, 4  ;;  %v1067_v38 = vadd.s32 1, %v2547_v19  ;;  %v623_v39 = vrot.slane %v618_v25, %v2876_v15 }
  0xb2   : > { %v672_v37 = vor.u32 %v671_v18, %v670_v30  ;;  %vm676_vm5 = vcmp.lt.s32.totalorder %v2946_v23, 4  ;;  %v2969_v40 = vshrl.u32 %v965_v60, 5  ;;  %v980_v41 = vshrl.u32 %v4263_v4, %v2949_v24 }
  0xb3   : > { %v2973_v42 = vshrl.u32 %v757_v62, 5  ;;  %v2978_v43 = vsel %vm884_vm4, %v2952_v27, 920167782  ;;  %v2982_v44 = vsel %vm884_vm4, %v880_v28, 1326507024  ;;  %v979_v46 = vshll.u32 %v4249_v0, %v2923_v2 }
  0xb4   : > { %v682_v45 = vsel %vm676_vm5, %v2954_v29, 920167782  ;;  %v983_v47 = vshrl.u32 %v4261_v7, %v2949_v24  ;;  %v772_v48 = vshrl.u32 %v4263_v4, %v2959_v33  ;;  %vm1172_vm6 = vcmp.gt.s32.totalorder %v1171_v34, 0 }
  0xb5   : > { %v2994_v49 = vmul.f32 %v2878_v16, %v632_v35  ;;  %v686_v52 = vsel %vm676_vm5, %v672_v37, 1326507024  ;;  %v775_v55 = vshrl.u32 %v4261_v7, %v2959_v33  ;;  %vm1068_vm7 = vcmp.gt.s32.totalorder %v1067_v38, 0 }
  0xb6   : > { %v3001_v56 = vmul.f32 %v2878_v16, %v623_v39  ;;  %v3003_v60 = vor.u32 %v980_v41, %v979_v46  ;;  %v982_v61 = vshll.u32 %v4263_v4, %v2923_v2  ;;  %vm988_vm8 = vcmp.lt.s32.totalorder %v2969_v40, 4 }
  0xb7   : > { %4289 = vst [vmem:[#allocation8_spill] sm:$0xff] %v2994_v49  ;;  %v771_v62 = vshll.u32 %v4249_v0, %v2937_v10  ;;  %v774_v63 = vshll.u32 %v4263_v4, %v2937_v10  ;;  %v1173_v1 = vsel %vm1172_vm6, %v1171_v34, 0  ;;  %v659_v5 = vshrl.u32 %v4253_v3, %v2919_v59 }
  0xb8   : > { %4290 = vst [vmem:[#allocation9_spill] sm:$0xff] %v3001_v56  ;;  %v4251_v6 = vmov 2131351028   ;;  %v984_v9 = vor.u32 %v983_v47, %v982_v61  ;;  %v1069_v17 = vsel %vm1068_vm7, %v1067_v38, 0  ;;  %v1372_v18 = vand.u32 2139095040, %v2994_v49 }
  0xb9   : > { %v662_v8 = vshrl.u32 %v4251_v6, %v2919_v59  ;;  %v3016_v11 = vor.u32 %v772_v48, %v771_v62  ;;  %v776_v19 = vor.u32 %v775_v55, %v774_v63  ;;  %v1268_v20 = vand.u32 2139095040, %v3001_v56 }
  0xba   : > { %v4255_v25 = vmov 683565275   ;;  %v661_v30 = vshll.u32 %v4253_v3, %v2910_v54  ;;  %v3027_v34 = vsel %vm988_vm8, %v3003_v60, 920167782  ;;  %vm780_vm9 = vcmp.lt.s32.totalorder %v2973_v42, 4 }
  0xbb   : > { %v658_v28 = vshll.u32 %v4255_v25, %v2910_v54  ;;  %v3030_v35 = vand.u32 31, %v1173_v1  ;;  %v665_v37 = vshrl.u32 %v4249_v0, %v2919_v59  ;;  %v3034_v38 = vand.u32 31, %v1069_v17 }
  0xbc   : > { %v663_v41 = vor.u32 %v662_v8, %v661_v30  ;;  %v664_v46 = vshll.u32 %v4251_v6, %v2910_v54  ;;  %v3040_v47 = vsel %vm988_vm8, %v984_v9, 1326507024  ;;  %v3045_v48 = vsel %vm780_vm9, %v3016_v11, 920167782 }
  0xbd   : > { %4291 = vst [vmem:[#allocation10_spill] sm:$0xff] %v3030_v35  ;;  %v660_v39 = vor.u32 %v659_v5, %v658_v28  ;;  %v1373_v55 = vshrl.u32 %v1372_v18, 23  ;;  %v689_v61 = vshll.u32 %v649_v26, 8  ;;  %v3049_v62 = vsel %vm780_vm9, %v776_v19, 1326507024 }
  0xbe   : > { %v3051_v63 = vshrl.u32 %v1173_v1, 5  ;;  %v1269_v5 = vshrl.u32 %v1268_v20, 23  ;;  %v666_v8 = vor.u32 %v665_v37, %v664_v46  ;;  %v3054_v54 = vsub.s32 32, %v3030_v35 }
  0xbf   : > { %v3056_v9 = vshrl.u32 %v1069_v17, 5  ;;  %v657_v28 = vshrl.u32 %v4255_v25, %v2919_v59  ;;  %vm673_vm10 = vcmp.lt.s32.totalorder %v2946_v23, 1  ;;  %v1187_v26 = vshll.u32 %v4249_v0, %v3030_v35 }
  0xc0   : > { %v3064_v18 = vsub.s32 32, %v3034_v38  ;;  %vm675_vm11 = vcmp.lt.s32.totalorder %v2946_v23, 3  ;;  %v681_v1 = vsel %vm673_vm10, %v660_v39, %v663_v41  ;;  %v2559_v19 = vadd.s32 4294967169, %v1373_v55 }
  0xc1   : > { %v678_v17 = vsel %vm676_vm5, %v666_v8, 2102212464  ;;  %v683_v59 = vsel %vm675_vm11, %v666_v8, %v682_v45  ;;  %v687_v20 = vsel %vm675_vm11, %v2954_v29, %v686_v52  ;;  %v3078_v30 = vshll.u32 %v4263_v4, %v3030_v35 }
  0xc2   : > { %v1083_v37 = vshll.u32 %v4249_v0, %v3034_v38  ;;  %v2555_v46 = vadd.s32 4294967169, %v1269_v5  ;;  %vm674_vm12 = vcmp.lt.s32.totalorder %v2946_v23, 2  ;;  %v1188_v55 = vshrl.u32 %v4263_v4, %v3054_v54 }
  0xc3   : > { %v3087_v45 = vshll.u32 %v4263_v4, %v3034_v38  ;;  %v684_v12 = vsel %vm674_vm12, %v681_v1, %v683_v59  ;;  %v685_v29 = vsel %vm673_vm10, %v663_v41, %v666_v8  ;;  %v1191_v52 = vshrl.u32 %v4261_v7, %v3054_v54 }
  0xc4   : > { %v677_v57 = vsel %vm673_vm10, %v657_v28, %v660_v39  ;;  %v679_v5 = vsel %vm675_vm11, %v663_v41, %v678_v17  ;;  %v688_v0 = vsel %vm674_vm12, %v685_v29, %v687_v20  ;;  %v1084_v6 = vshrl.u32 %v4263_v4, %v3064_v18 }
  0xc5   : > { %v1379_v3 = vadd.s32 1, %v2559_v19  ;;  %v3099_v25 = vmul.u32.u64.low %v689_v61, %v688_v0  ;;  %v3100_v15 = vmul.u32.u64.high %v689_v61, %v688_v0, %v3099_v25  ;;  %v3104_v8 = vshrl.u32 %v4261_v7, %v3064_v18 }
  0xc6   : > { %v1275_v1 = vadd.s32 1, %v2555_v46  ;;  %v3106_v59 = vmul.u32.u64.low %v689_v61, %v684_v12  ;;  %v3107_v16 = vmul.u32.u64.high %v689_v61, %v684_v12, %v3106_v59  ;;  %v680_v39 = vsel %vm674_vm12, %v677_v57, %v679_v5 }
  0xc7   : > { %v857_v23 = vor.u32 8388608, %v2964_v36  ;;  %v4292_v41 = vmov 683565275   ;;  %v4293_v19 = vmov 2475754826   ;;  %vm1380_vm13 = vcmp.gt.s32.totalorder %v1379_v3, 0 }
  0xc8   : > { %v866_v28 = vshll.u32 %v4292_v41, %v2908_v53  ;;  %v867_v17 = vshrl.u32 %v4293_v19, %v2916_v58  ;;  %v869_v0 = vshll.u32 %v4293_v19, %v2908_v53  ;;  %v4294_v25 = vmov 2131351028  }
  0xc9   : > { %v870_v20 = vshrl.u32 %v4294_v25, %v2916_v58  ;;  %v872_v12 = vshll.u32 %v4294_v25, %v2908_v53  ;;  %v4295_v46 = vmov 2102212464   ;;  %vm698_vm14 = vc.u32 %v3100_v15, %v3106_v59 }
  0xca   : > { %v873_v57 = vshrl.u32 %v4295_v46, %v2916_v58  ;;  %v865_v36 = vshrl.u32 %v4292_v41, %v2916_v58  ;;  %v868_v29 = vor.u32 %v867_v17, %v866_v28  ;;  %v696_v5 = vmul.u32 %v689_v61, %v680_v39 }
  0xcb   : > { %v699_v7 = vadd.s32 1, %v3107_v16  ;;  %v871_v4 = vor.u32 %v870_v20, %v869_v0  ;;  %vm881_vm15 = vcmp.lt.s32.totalorder %v2940_v13, 1  ;;  %vm882_vm0 = vcmp.lt.s32.totalorder %v2940_v13, 2 }
  0xcc   : > { %v874_v14 = vor.u32 %v873_v57, %v872_v12  ;;  %vm883_vm1 = vcmp.lt.s32.totalorder %v2940_v13, 3  ;;  %v897_v53 = vshll.u32 %v857_v23, 8  ;;  %v885_v39 = vsel %vm881_vm15, %v865_v36, %v868_v29 }
  0xcd   : > { %v700_v49 = vsel %vm698_vm14, %v699_v7, %v3107_v16  ;;  %v889_v35 = vsel %vm881_vm15, %v868_v29, %v871_v4  ;;  %v895_v20 = vsel %vm883_vm1, %v2952_v27, %v2982_v44  ;;  %v3143_v16 = vor.u32 %v1188_v55, %v1187_v26 }
  0xce   : > { %v886_v56 = vsel %vm884_vm4, %v874_v14, 2102212464  ;;  %v891_v58 = vsel %vm883_vm1, %v874_v14, %v2978_v43  ;;  %v701_v61 = vadd.s32 %v700_v49, %v696_v5  ;;  %v893_v17 = vsel %vm881_vm15, %v871_v4, %v874_v14 }
  0xcf   : > { %v892_v28 = vsel %vm882_vm0, %v889_v35, %v891_v58  ;;  %v887_v0 = vsel %vm883_vm1, %v871_v4, %v886_v56  ;;  %v1192_v7 = vor.u32 %v1191_v52, %v3078_v30  ;;  %v896_v43 = vsel %vm882_vm0, %v893_v17, %v895_v20 }
  0xd0   : > { %v3139_v12 = vmul.u32.u64.low %v897_v53, %v892_v28  ;;  %v3140_v23 = vmul.u32.u64.high %v897_v53, %v892_v28, %v3139_v12  ;;  %v702_v57 = vadd.s32 536870912, %v701_v61  ;;  %v3148_v49 = vor.u32 %v1084_v6, %v1083_v37 }
  0xd1   : > { %vm1276_vm2 = vcmp.gt.s32.totalorder %v1275_v1, 0  ;;  %v3150_v14 = vmul.u32.u64.low %v897_v53, %v896_v43  ;;  %v3151_v4 = vmul.u32.u64.high %v897_v53, %v896_v43, %v3150_v14  ;;  %vm1196_vm3 = vcmp.lt.s32.totalorder %v3051_v63, 4 }
  0xd2   : > { %v1381_v27 = vsel %vm1380_vm13, %v1379_v3, 0  ;;  %v703_v44 = vshrl.u32 %v702_v57, 30  ;;  %v888_v56 = vsel %vm882_vm0, %v885_v39, %v887_v0  ;;  %v1088_v35 = vor.u32 %v3104_v8, %v3087_v45 }
  0xd3   : > { %vm1092_vm4 = vcmp.lt.s32.totalorder %v3056_v9, 4  ;;  %v907_v6 = vadd.s32 1, %v3140_v23  ;;  %v4273_v26 = vand.u32 2147483647, %v2896_v32  ;;  %v3165_v30 = vsel %vm1196_vm3, %v3143_v16, 920167782 }
  0xd4   : > { %v3169_v3 = vsel %vm1196_vm3, %v1192_v7, 1326507024  ;;  %v3171_v13 = vsel %vm1276_vm2, %v1275_v1, 0  ;;  %v704_v37 = vshll.u32 %v703_v44, 30  ;;  %v3176_v55 = vsel %vm1092_vm4, %v3148_v49, 920167782 }
  0xd5   : > { %4296 = vst [vmem:[#allocation11_spill] sm:$0xff] %v3171_v13  ;;  %v3178_v45 = vand.u32 31, %v1381_v27  ;;  %v904_v52 = vmul.u32 %v897_v53, %v888_v56  ;;  %vm906_vm5 = vc.u32 %v3151_v4, %v3139_v12  ;;  %v766_v1 = vshrl.u32 %v4294_v25, %v2959_v33 }
  0xd6   : > { %v3182_v8 = vsub.s32 %v701_v61, %v704_v37  ;;  %v908_v36 = vsel %vm906_vm5, %v907_v6, %v3140_v23  ;;  %v769_v29 = vshrl.u32 %v4295_v46, %v2959_v33  ;;  %v3191_v5 = vsel %vm1092_vm4, %v1088_v35, 1326507024 }
  0xd7   : > { %4297 = vst [vmem:[#allocation12_spill] sm:$0xff] %v3178_v45  ;;  %v3194_v58 = vand.u32 31, %v3171_v13  ;;  %vm643_vm6 = vcmp.lt.s32.totalorder %v2886_v22, 0  ;;  %v909_v53 = vadd.s32 %v908_v36, %v904_v52  ;;  %v752_v61 = vand.u32 8388607, %v4273_v26 }
  0xd8   : > { %v707_v39 = vsub.s32 0, %v3182_v8  ;;  %v763_v28 = vshrl.u32 %v4293_v19, %v2959_v33  ;;  %v765_v17 = vshll.u32 %v4293_v19, %v2937_v10  ;;  %v768_v0 = vshll.u32 %v4294_v25, %v2937_v10 }
  0xd9   : > { %v3206_v20 = vshrl.u32 %v1381_v27, 5  ;;  %v3209_v23 = vsub.s32 32, %v3178_v45  ;;  %v3213_v7 = vshll.u32 %v4295_v46, %v3178_v45  ;;  %v910_v57 = vadd.s32 536870912, %v909_v53 }
  0xda   : > { %v2532_v43 = vmin.u32 %v707_v39, %v3182_v8  ;;  %v762_v14 = vshll.u32 %v4292_v41, %v2937_v10  ;;  %v767_v56 = vor.u32 %v766_v1, %v765_v17  ;;  %v770_v35 = vor.u32 %v769_v29, %v768_v0 }
  0xdb   : > { %4298 = vst [vmem:[#allocation13_spill] sm:$0xff] %v3206_v20  ;;  %4299 = vst [vmem:[#allocation14_spill] sm:$0xff] %v3209_v23  ;;  %v4300_v6 = vmov 920167782   ;;  %v3223_v27 = vsub.s32 32, %v3194_v58  ;;  %v3231_v26 = vshrl.u32 %v910_v57, 30  ;;  %v697_v10 = vadd.s32 %v3106_v59, %v3100_v15 }
  0xdc   : > { %v3220_v37 = vshll.u32 %v4300_v6, %v3178_v45  ;;  %v4302_v52 = vand.u32 2147483647, %v2886_v22  ;;  %v753_v39 = vor.u32 8388608, %v752_v61  ;;  %v709_v1 = vclz %v2532_v43 }
  0xdd   : > { %v727_v29 = vsub.s32 4, %v703_v44  ;;  %v764_v17 = vor.u32 %v763_v28, %v762_v14  ;;  %v912_v0 = vshll.u32 %v3231_v26, 30  ;;  %v761_v45 = vshrl.u32 %v4292_v41, %v2959_v33 }
  0xde   : > { %4301 = vst [vmem:[#allocation15_spill] sm:$0xff] %v3220_v37  ;;  %vm3227_vm7 = vcmp.le.f32.partialorder %v4302_v52, 0.7853982  ;;  %vm777_vm10 = vcmp.lt.s32.totalorder %v2973_v42, 1  ;;  %vm779_vm11 = vcmp.lt.s32.totalorder %v2973_v42, 3  ;;  %v2533_v52 = vadd.s32 4294967294, %v709_v1 }
  0xdf   : > { %vm778_vm12 = vcmp.lt.s32.totalorder %v2973_v42, 2  ;;  %v789_v61 = vsel %vm777_vm10, %v767_v56, %v770_v35  ;;  %v791_v15 = vsel %vm779_vm11, %v3016_v11, %v3049_v62  ;;  %v3247_v59 = vsub.s32 %v909_v53, %v912_v0 }
  0xe0   : > { %v782_v33 = vsel %vm780_vm9, %v770_v35, 2102212464  ;;  %v792_v28 = vsel %vm778_vm12, %v789_v61, %v791_v15  ;;  %v793_v57 = vshll.u32 %v753_v39, 8  ;;  %vm2534_vm13 = vcmp.lt.s32.totalorder %v2533_v52, 0 }
  0xe1   : > { %v728_v43 = vsel %vm643_vm6, %v727_v29, %v703_v44  ;;  %v785_v14 = vsel %vm777_vm10, %v764_v17, %v767_v56  ;;  %v787_v11 = vsel %vm779_vm11, %v770_v35, %v3045_v48  ;;  %v712_v62 = vsel %vm2534_vm13, 0, %v2533_v52 }
  0xe2   : > { %v915_v53 = vsub.s32 0, %v3247_v59  ;;  %v3261_v1 = vmul.u32.u64.low %v793_v57, %v792_v28  ;;  %v3262_v0 = vmul.u32.u64.high %v793_v57, %v792_v28, %v3261_v1  ;;  %v713_v13 = vsub.s32 32, %v712_v62 }
  0xe3   : > { %v717_v61 = vsub.s32 4294967266, %v712_v62  ;;  %v781_v39 = vsel %vm777_vm10, %v761_v45, %v764_v17  ;;  %v783_v44 = vsel %vm779_vm11, %v767_v56, %v782_v33  ;;  %v3270_v29 = vshrl.u32 %v4300_v6, %v3209_v23 }
  0xe4   : > { %v3274_v48 = vshll.u32 %v4295_v46, %v3194_v58  ;;  %v2540_v35 = vmin.u32 %v915_v53, %v3247_v59  ;;  %v788_v52 = vsel %vm778_vm12, %v785_v14, %v787_v11  ;;  %v714_v15 = vshll.u32 %v3182_v8, %v712_v62 }
  0xe5   : > { %v715_v28 = vshrl.u32 %v697_v10, %v713_v13  ;;  %v718_v45 = vadd.s32 127, %v717_v61  ;;  %v730_v56 = vsel %vm3227_vm7, 0, %v728_v43  ;;  %v4306_v17 = vmov 1326507024  }
  0xe6   : > { %4305 = vst [vmem:[#allocation16_spill] sm:$0xff] %v3274_v48  ;;  %v3284_v33 = vshrl.u32 %v4306_v17, %v3209_v23  ;;  %v917_v1 = vclz %v2540_v35  ;;  %v784_v48 = vsel %vm778_vm12, %v781_v39, %v783_v44  ;;  %v4279_v53 = vand.u32 2147483647, %v2893_v31 }
  0xe7   : > { %v716_v20 = vor.u32 %v715_v28, %v714_v15  ;;  %v719_v37 = vshll.u32 %v718_v45, 23  ;;  %vm851_vm9 = vcmp.lt.s32.totalorder %v2883_v21, 0  ;;  %v3296_v10 = vshrl.u32 %v4300_v6, %v3223_v27 }
  0xe8   : > { %4307 = vst [vmem:[#allocation17_spill] sm:$0xff] %v3284_v33  ;;  %v3290_v8 = vmul.u32.u64.low %v793_v57, %v788_v52  ;;  %v3291_v13 = vmul.u32.u64.high %v793_v57, %v788_v52, %v3290_v8  ;;  %v734_v43 = vadd.s32 3, %v730_v56  ;;  %v905_v14 = vadd.s32 %v3139_v12, %v3151_v4 }
  0xe9   : > { %4308 = vst [vmem:[#allocation18_spill] sm:$0xff] %v3296_v10  ;;  %v2541_v42 = vadd.s32 4294967294, %v917_v1  ;;  %v720_v11 = vor.u32 4788187, %v719_v37  ;;  %v3300_v62 = vand.u32 3, %v730_v56  ;;  %v935_v61 = vsub.s32 4, %v3231_v26 }
  0xea   : > { %v800_v39 = vmul.u32 %v793_v57, %v784_v48  ;;  %v723_v44 = vcvt.s32.f32 %v716_v20  ;;  %vm802_vm15 = vc.u32 %v3262_v0, %v3290_v8  ;;  %v960_v35 = vand.u32 8388607, %v4279_v53 }
  0xeb   : > { %vm2542_vm14 = vcmp.lt.s32.totalorder %v2541_v42, 0  ;;  %v721_v52 = vand.u32 2147483647, %v720_v11  ;;  %v803_v28 = vadd.s32 1, %v3291_v13  ;;  %v971_v12 = vshrl.u32 %v4293_v19, %v2949_v24 }
  0xec   : > { %v920_v15 = vsel %vm2542_vm14, 0, %v2541_v42  ;;  %v970_v20 = vshll.u32 %v4292_v41, %v2923_v2  ;;  %v973_v56 = vshll.u32 %v4293_v19, %v2923_v2  ;;  %v974_v1 = vshrl.u32 %v4294_v25, %v2949_v24 }
  0xed   : > { %v921_v4 = vsub.s32 32, %v920_v15  ;;  %v922_v37 = vshll.u32 %v3247_v59, %v920_v15  ;;  %v925_v45 = vsub.s32 4294967266, %v920_v15  ;;  %v724_v57 = vmul.f32 %v723_v44, %v721_v52 }
  0xee   : > { %v804_v48 = vsel %vm802_vm15, %v803_v28, %v3291_v13  ;;  %v4309_v42 = vand.u32 2147483647, %v2883_v21  ;;  %v972_v23 = vor.u32 %v971_v12, %v970_v20  ;;  %v975_v44 = vor.u32 %v974_v1, %v973_v56 }
  0xef   : > { %v923_v59 = vshrl.u32 %v905_v14, %v921_v4  ;;  %v926_v15 = vadd.s32 127, %v925_v45  ;;  %v805_v53 = vadd.s32 %v804_v48, %v800_v39  ;;  %v725_v10 = vxor.u32 2147483648, %v724_v57 }
  0xf0   : > { %vm3320_vm0 = vcmp.le.f32.partialorder %v4309_v42, 0.7853982  ;;  %v976_v13 = vshll.u32 %v4294_v25, %v2923_v2  ;;  %v977_v52 = vshrl.u32 %v4295_v46, %v2949_v24  ;;  %v936_v42 = vsel %vm851_vm9, %v935_v61, %v3231_v26 }
  0xf1   : > { %v924_v28 = vor.u32 %v923_v59, %v922_v37  ;;  %v927_v33 = vshll.u32 %v926_v15, 23  ;;  %v806_v6 = vadd.s32 536870912, %v805_v53  ;;  %v726_v14 = vsel %vm643_vm6, %v725_v10, %v724_v57 }
  0xf2   : > { %v961_v39 = vor.u32 8388608, %v960_v35  ;;  %v978_v12 = vor.u32 %v977_v52, %v976_v13  ;;  %vm985_vm1 = vcmp.lt.s32.totalorder %v2969_v40, 1  ;;  %v729_v2 = vsel %vm3227_vm7, %v2886_v22, %v726_v14 }
  0xf3   : > { %v928_v4 = vor.u32 4788187, %v927_v33  ;;  %v807_v45 = vshrl.u32 %v806_v6, 30  ;;  %vm987_vm2 = vcmp.lt.s32.totalorder %v2969_v40, 3  ;;  %2696 = vcosq.f32 %v729_v2 }
  0xf4   : > { %vm747_vm5 = vcmp.lt.s32.totalorder %v2896_v32, 0  ;;  %v969_v26 = vshrl.u32 %v4292_v41, %v2949_v24  ;;  %v993_v10 = vsel %vm985_vm1, %v972_v23, %v975_v44  ;;  %v995_v61 = vsel %vm987_vm2, %v978_v12, %v3027_v34 }
  0xf5   : > { %2698 = vsinq.f32 %v729_v2  ;;  %v929_v36 = vand.u32 2147483647, %v928_v4  ;;  %v931_v35 = vcvt.s32.f32 %v924_v28  ;;  %v808_v33 = vshll.u32 %v807_v45, 30 }
  0xf6   : > { %vm986_vm6 = vcmp.lt.s32.totalorder %v2969_v40, 2  ;;  %v990_v6 = vsel %vm988_vm8, %v978_v12, 2102212464  ;;  %v997_v37 = vsel %vm985_vm1, %v975_v44, %v978_v12  ;;  %v999_v24 = vsel %vm987_vm2, %v3003_v60, %v3040_v47 }
  0xf7   : > { %v735_v20 = vand.u32 3, %v734_v43  ;;  %v932_v57 = vmul.f32 %v931_v35, %v929_v36  ;;  %v4312_v34 = vand.u32 2147483647, %v2896_v32  ;;  %v3361_v56 = vsub.s32 %v805_v53, %v808_v33 }
  0xf8   : > { %v996_v1 = vsel %vm986_vm6, %v993_v10, %v995_v61  ;;  %v938_v59 = vsel %vm3320_vm0, 0, %v936_v42  ;;  %v989_v15 = vsel %vm985_vm1, %v969_v26, %v972_v23  ;;  %v1000_v60 = vsel %vm986_vm6, %v997_v37, %v999_v24 }
  0xf9   : > { %vm3357_vm7 = vcmp.le.f32.partialorder %v4312_v34, 0.7853982  ;;  %v1001_v47 = vshll.u32 %v961_v39, 8  ;;  %v933_v43 = vxor.u32 2147483648, %v932_v57  ;;  %v811_v13 = vsub.s32 0, %v3361_v56 }
  0xfa   : > { %v831_v52 = vsub.s32 4, %v807_v45  ;;  %v991_v53 = vsel %vm987_vm2, %v975_v44, %v990_v6  ;;  %vm1567_vm8 = vcmp.lt.s32.totalorder %v3300_v62, 2  ;;  %vm733_vm10 = vweird.f32 %v2886_v22 }
  0xfb   : > { %v3375_v28 = vmul.u32.u64.low %v1001_v47, %v1000_v60  ;;  %v3376_v14 = vmul.u32.u64.high %v1001_v47, %v1000_v60, %v3375_v28  ;;  %v3378_v42 = vmul.u32.u64.low %v1001_v47, %v996_v1  ;;  %v3379_v12 = vmul.u32.u64.high %v1001_v47, %v996_v1, %v3378_v42 }
  0xfc   : > { %vm1568_vm11 = vcmp.eq.s32.totalorder %v3300_v62, 0  ;;  %v934_v23 = vsel %vm851_vm9, %v933_v43, %v932_v57  ;;  %v942_v39 = vadd.s32 3, %v938_v59  ;;  %v2536_v2 = vmin.u32 %v811_v13, %v3361_v56 }
  0xfd   : > { %vm736_vm12 = vcmp.lt.s32.totalorder %v735_v20, 2  ;;  %vm737_vm13 = vcmp.eq.s32.totalorder %v735_v20, 0  ;;  %vm1571_vm14 = vcmp.eq.s32.totalorder %v3300_v62, 2  ;;  %v937_v44 = vsel %vm3320_vm0, %v2883_v21, %v934_v23  ;;  %v2697_v61 = vpop.eup %2696 }
  0xfe   : > { %2700 = vcosq.f32 %v937_v44  ;;  %v813_v4 = vclz %v2536_v2  ;;  %v832_v26 = vsel %vm747_vm5, %v831_v52, %v807_v45  ;;  %v992_v10 = vsel %vm986_vm6, %v989_v15, %v991_v53 }
  0xff   : > { %vm740_vm9 = vcmp.eq.s32.totalorder %v735_v20, 2  ;;  %2702 = vsinq.f32 %v937_v44  ;;  %v3395_v36 = vand.u32 3, %v938_v59  ;;  %vm1010_vm15 = vc.u32 %v3376_v14, %v3378_v42  ;;  %v2699_v35 = vpop.eup %2698 }
 0x100   : > { %v741_v33 = vxor.u32 2147483648, %v2697_v61  ;;  %v943_v11 = vand.u32 3, %v942_v39  ;;  %v2537_v6 = vadd.s32 4294967294, %v813_v4  ;;  %v1011_v37 = vadd.s32 1, %v3379_v12 }
 0x101   : > { %v738_v24 = vxor.u32 2147483648, %v2699_v35  ;;  %v801_v45 = vadd.s32 %v3290_v8, %v3262_v0  ;;  %v3404_v40 = vsel %vm3357_vm7, 0, %v832_v26  ;;  %v1008_v57 = vmul.u32 %v1001_v47, %v992_v10 }
 0x102   : > { %v1573_v34 = vsel %vm1571_vm14, %v741_v33, %v2699_v35  ;;  %v742_v1 = vsel %vm740_vm9, %v741_v33, %v2699_v35  ;;  %vm2538_vm0 = vcmp.lt.s32.totalorder %v2537_v6, 0  ;;  %v1012_v59 = vsel %vm1010_vm15, %v1011_v37, %v3379_v12 }
 0x103   : > { %v1570_v15 = vsel %vm1568_vm11, %v2697_v61, %v738_v24  ;;  %v739_v60 = vsel %vm737_vm13, %v2697_v61, %v738_v24  ;;  %vm1774_vm1 = vcmp.eq.s32.totalorder %v3395_v36, 0  ;;  %v816_v0 = vsel %vm2538_vm0, 0, %v2537_v6 }
 0x104   : > { %v1013_v8 = vadd.s32 %v1012_v59, %v1008_v57  ;;  %v1574_v43 = vsel %vm1567_vm8, %v1570_v15, %v1573_v34  ;;  %v743_v47 = vsel %vm736_vm12, %v739_v60, %v742_v1  ;;  %vm1773_vm2 = vcmp.lt.s32.totalorder %v3395_v36, 2 }
 0x105   : > { %v817_v13 = vsub.s32 32, %v816_v0  ;;  %v1057_v52 = vand.u32 2147483647, %v2906_v51  ;;  %v1575_v53 = vsel %vm733_vm10, nan, %v1574_v43  ;;  %v3422_v28 = vsel %vm733_vm10, nan, %v743_v47 }
 0x106   : > { %vm941_vm6 = vweird.f32 %v2883_v21  ;;  %v821_v12 = vsub.s32 4294967266, %v816_v0  ;;  %v1014_v23 = vadd.s32 536870912, %v1013_v8  ;;  %2305 = vrot.lane.b32.xlu0 %v1575_v53, %s2807_s22  ;;  %vm1777_vm8 = vcmp.eq.s32.totalorder %v3395_v36, 2 }
 0x107   : > { %v818_v62 = vshll.u32 %v3361_v56, %v816_v0  ;;  %v819_v20 = vshrl.u32 %v801_v45, %v817_v13  ;;  %v1075_v39 = vshrl.u32 %v4293_v19, %v3064_v18  ;;  %vm944_vm11 = vcmp.lt.s32.totalorder %v943_v11, 2 }
 0x108   : > { %vm945_vm12 = vcmp.eq.s32.totalorder %v943_v11, 0  ;;  %v822_v22 = vadd.s32 127, %v821_v12  ;;  %v3430_v2 = vshrl.u32 %v1014_v23, 30  ;;  %v2701_v44 = vpop.eup %2700  ;;  %vm948_vm10 = vcmp.eq.s32.totalorder %v943_v11, 2 }
 0x109   : > { %v820_v4 = vor.u32 %v819_v20, %v818_v62  ;;  %v838_v26 = vadd.s32 3, %v3404_v40  ;;  %v1074_v10 = vshll.u32 %v4292_v41, %v3034_v38  ;;  %v2703_v61 = vpop.eup %2702  ;;  %v949_v35 = vxor.u32 2147483648, %v2701_v44 }
 0x10a   : > { %v823_v56 = vshll.u32 %v822_v22, 23  ;;  %v1016_v33 = vshll.u32 %v3430_v2, 30  ;;  %v1064_v6 = vand.u32 8388607, %v1057_v52  ;;  %v946_v37 = vxor.u32 2147483648, %v2703_v61 }
 0x10b   : > { %v1076_v24 = vor.u32 %v1075_v39, %v1074_v10  ;;  %v1077_v45 = vshll.u32 %v4293_v19, %v3034_v38  ;;  %v1078_v57 = vshrl.u32 %v4294_v25, %v3064_v18  ;;  %v950_v34 = vsel %vm948_vm10, %v949_v35, %v2703_v61 }
 0x10c   : > { %v1779_v1 = vsel %vm1777_vm8, %v949_v35, %v2703_v61  ;;  %v824_v59 = vor.u32 4788187, %v823_v56  ;;  %v3444_v15 = vsub.s32 %v1013_v8, %v1016_v33  ;;  %v947_v60 = vsel %vm945_vm12, %v2701_v44, %v946_v37 }
 0x10d   : > { %v1776_v0 = vsel %vm1774_vm1, %v2701_v44, %v946_v37  ;;  %v827_v43 = vcvt.s32.f32 %v820_v4  ;;  %v1081_v47 = vshrl.u32 %v4295_v46, %v3064_v18  ;;  %v951_v13 = vsel %vm944_vm11, %v947_v60, %v950_v34 }
 0x10e   : > { %v1780_v53 = vsel %vm1773_vm2, %v1776_v0, %v1779_v1  ;;  %v825_v12 = vand.u32 2147483647, %v824_v59  ;;  %v1019_v23 = vsub.s32 0, %v3444_v15  ;;  %v3457_v8 = vsel %vm941_vm6, nan, %v951_v13 }
 0x10f   : > { %v1781_v62 = vsel %vm941_vm6, nan, %v1780_v53  ;;  %v1079_v20 = vor.u32 %v1078_v57, %v1077_v45  ;;  %v1080_v39 = vshll.u32 %v4294_v25, %v3034_v38  ;;  %v3465_v11 = vor.u32 %v3270_v29, %v3213_v7 }
 0x110   : > { %v3469_v36 = vshrl.u32 %v4306_v17, %v3223_v27  ;;  %2309 = vrot.lane.b32.xlu0 %v1781_v62, %s2807_s22  ;;  %v828_v22 = vmul.f32 %v827_v43, %v825_v12  ;;  %v2544_v44 = vmin.u32 %v1019_v23, %v3444_v15  ;;  %v3473_v4 = vand.u32 3, %v838_v26 }
 0x111   : > { %v3476_v21 = vand.u32 3, %v3404_v40  ;;  %vm955_vm13 = vcmp.lt.s32.totalorder %v2893_v31, 0  ;;  %v1082_v38 = vor.u32 %v1081_v47, %v1080_v39  ;;  %v1009_v7 = vadd.s32 %v3378_v42, %v3376_v14 }
 0x112   : > { %v829_v10 = vxor.u32 2147483648, %v828_v22  ;;  %v1021_v29 = vclz %v2544_v44  ;;  %vm1089_vm14 = vcmp.lt.s32.totalorder %v3056_v9, 1  ;;  %v1039_v61 = vsub.s32 4, %v3430_v2 }
 0x113   : > { %v1065_v35 = vor.u32 8388608, %v1064_v6  ;;  %v1073_v26 = vshrl.u32 %v4292_v41, %v3064_v18  ;;  %v1097_v40 = vsel %vm1089_vm14, %v1076_v24, %v1079_v20  ;;  %v4315_v33 = vand.u32 2147483647, %v2893_v31 }
 0x114   : > { %v830_v56 = vsel %vm747_vm5, %v829_v10, %v828_v22  ;;  %v2545_v14 = vadd.s32 4294967294, %v1021_v29  ;;  %vm1090_vm15 = vcmp.lt.s32.totalorder %v3056_v9, 2  ;;  %vm1091_vm0 = vcmp.lt.s32.totalorder %v3056_v9, 3 }
 0x115   : > { %vm3491_vm9 = vcmp.le.f32.partialorder %v4315_v33, 0.7853982  ;;  %v833_v18 = vsel %vm3357_vm7, %v2896_v32, %v830_v56  ;;  %v1093_v42 = vsel %vm1089_vm14, %v1073_v26, %v1076_v24  ;;  %v1094_v6 = vsel %vm1092_vm4, %v1082_v38, 2102212464 }
 0x116   : > { %v1099_v45 = vsel %vm1091_vm0, %v1082_v38, %v3176_v55  ;;  %2704 = vcosq.f32 %v833_v18  ;;  %vm2546_vm5 = vcmp.lt.s32.totalorder %v2545_v14, 0  ;;  %v1101_v34 = vsel %vm1089_vm14, %v1079_v20, %v1082_v38 }
 0x117   : > { %v1100_v57 = vsel %vm1090_vm15, %v1097_v40, %v1099_v45  ;;  %2706 = vsinq.f32 %v833_v18  ;;  %v1024_v1 = vsel %vm2546_vm5, 0, %v2545_v14  ;;  %v1103_v48 = vsel %vm1091_vm0, %v3148_v49, %v3191_v5 }
 0x118   : > { %v1105_v59 = vshll.u32 %v1065_v35, 8  ;;  %v1025_v24 = vsub.s32 32, %v1024_v1  ;;  %v1029_v60 = vsub.s32 4294967266, %v1024_v1  ;;  %v1095_v0 = vsel %vm1091_vm0, %v1079_v20, %v1094_v6 }
 0x119   : > { %v1104_v55 = vsel %vm1090_vm15, %v1101_v34, %v1103_v48  ;;  %v1026_v12 = vshll.u32 %v3444_v15, %v1024_v1  ;;  %v1040_v49 = vsel %vm955_vm13, %v1039_v61, %v3430_v2  ;;  %vm1671_vm4 = vcmp.eq.s32.totalorder %v3476_v21, 0 }
 0x11a   : > { %v3513_v43 = vmul.u32.u64.low %v1105_v59, %v1104_v55  ;;  %v3514_v47 = vmul.u32.u64.high %v1105_v59, %v1104_v55, %v3513_v43  ;;  %v3516_v13 = vmul.u32.u64.low %v1105_v59, %v1100_v57  ;;  %v3517_v53 = vmul.u32.u64.high %v1105_v59, %v1100_v57, %v3516_v13 }
 0x11b   : > { %v1027_v23 = vshrl.u32 %v1009_v7, %v1025_v24  ;;  %v1030_v62 = vadd.s32 127, %v1029_v60  ;;  %vm1674_vm7 = vcmp.eq.s32.totalorder %v3476_v21, 2  ;;  %v1096_v5 = vsel %vm1090_vm15, %v1093_v42, %v1095_v0  ;;  %v4318_v7 = vld [vmem:[#allocation10_spill] sm:$0xff] }
 0x11c   : > { %v1161_v20 = vand.u32 2147483647, %v2903_v50  ;;  %vm840_vm1 = vcmp.lt.s32.totalorder %v3473_v4, 2  ;;  %vm841_vm2 = vcmp.eq.s32.totalorder %v3473_v4, 0  ;;  %vm844_vm6 = vcmp.eq.s32.totalorder %v3473_v4, 2 }
 0x11d   : > { %vm1670_vm8 = vcmp.lt.s32.totalorder %v3476_v21, 2  ;;  %v1028_v15 = vor.u32 %v1027_v23, %v1026_v12  ;;  %v1031_v39 = vshll.u32 %v1030_v62, 23  ;;  %vm837_vm11 = vweird.f32 %v2896_v32 }
 0x11e   : > { %v1042_v2 = vsel %vm3491_vm9, 0, %v1040_v49  ;;  %vm1114_vm12 = vc.u32 %v3514_v47, %v3516_v13  ;;  %v1115_v9 = vadd.s32 1, %v3517_v53  ;;  %v1179_v22 = vshrl.u32 %v4293_v19, %v3054_v54 }
 0x11f   : > { %v1032_v44 = vor.u32 4788187, %v1031_v39  ;;  %v1112_v38 = vmul.u32 %v1105_v59, %v1096_v5  ;;  %v1168_v10 = vand.u32 8388607, %v1161_v20  ;;  %v1178_v29 = vshll.u32 %v4292_v41, %v4318_v7 }
 0x120   : > { %v1116_v61 = vsel %vm1114_vm12, %v1115_v9, %v3517_v53  ;;  %v1181_v35 = vshll.u32 %v4293_v19, %v4318_v7  ;;  %v1182_v26 = vshrl.u32 %v4294_v25, %v3054_v54  ;;  %v1185_v40 = vshrl.u32 %v4295_v46, %v3054_v54  ;;  %v2705_v56 = vpop.eup %2704 }
 0x121   : > { %v1033_v33 = vand.u32 2147483647, %v1032_v44  ;;  %v1035_v14 = vcvt.s32.f32 %v1028_v15  ;;  %v1046_v18 = vadd.s32 3, %v1042_v2  ;;  %v1117_v42 = vadd.s32 %v1116_v61, %v1112_v38  ;;  %v2707_v6 = vpop.eup %2706 }
 0x122   : > { %v845_v45 = vxor.u32 2147483648, %v2705_v56  ;;  %v1180_v57 = vor.u32 %v1179_v22, %v1178_v29  ;;  %v1183_v34 = vor.u32 %v1182_v26, %v1181_v35  ;;  %v1184_v1 = vshll.u32 %v4294_v25, %v4318_v7 }
 0x123   : > { %v842_v48 = vxor.u32 2147483648, %v2707_v6  ;;  %v1036_v59 = vmul.f32 %v1035_v14, %v1033_v33  ;;  %v1118_v24 = vadd.s32 536870912, %v1117_v42  ;;  %v1169_v60 = vor.u32 8388608, %v1168_v10 }
 0x124   : > { %v1676_v0 = vsel %vm1674_vm7, %v845_v45, %v2707_v6  ;;  %v846_v55 = vsel %vm844_vm6, %v845_v45, %v2707_v6  ;;  %v1186_v43 = vor.u32 %v1185_v40, %v1184_v1  ;;  %vm1193_vm10 = vcmp.lt.s32.totalorder %v3051_v63, 1  ;;  %v4320_v6 = vld [vmem:[#allocation15_spill] sm:$0xff]  ;;  %v4321_v45 = vld [vmem:[#allocation17_spill] sm:$0xff] }
 0x125   : > { %v1673_v53 = vsel %vm1671_vm4, %v2705_v56, %v842_v48  ;;  %v843_v12 = vsel %vm841_vm2, %v2705_v56, %v842_v48  ;;  %v1037_v23 = vxor.u32 2147483648, %v1036_v59  ;;  %v3563_v62 = vshrl.u32 %v1118_v24, 30  ;;  %v4323_v48 = vld [vmem:[#allocation11_spill] sm:$0xff]  ;;  %v4325_v24 = vld [vmem:[#allocation18_spill] sm:$0xff] }
 0x126   : > { %v1677_v49 = vsel %vm1670_vm8, %v1673_v53, %v1676_v0  ;;  %v847_v5 = vsel %vm840_vm1, %v843_v12, %v846_v55  ;;  %vm1195_vm14 = vcmp.lt.s32.totalorder %v3051_v63, 3  ;;  %v1201_v15 = vsel %vm1193_vm10, %v1180_v57, %v1183_v34 }
 0x127   : > { %v1678_v39 = vsel %vm837_vm11, nan, %v1677_v49  ;;  %v3576_v9 = vsel %vm837_vm11, nan, %v847_v5  ;;  %v1038_v22 = vsel %vm955_vm13, %v1037_v23, %v1036_v59  ;;  %v1120_v21 = vshll.u32 %v3563_v62, 30  ;;  %v4324_v59 = vld [vmem:[#allocation16_spill] sm:$0xff] }
 0x128   : > { %2307 = vrot.lane.b32.xlu1 %v1678_v39, %s2807_s22  ;;  %v1041_v4 = vsel %vm3491_vm9, %v2893_v31, %v1038_v22  ;;  %v1177_v44 = vshrl.u32 %v4292_v41, %v3054_v54  ;;  %vm1194_vm15 = vcmp.lt.s32.totalorder %v3051_v63, 2  ;;  %v1203_v32 = vsel %vm1195_vm14, %v1186_v43, %v3165_v30  ;;  %v4326_v39 = vld [vmem:[#allocation9_spill] sm:$0xff] }
 0x129   : > { %2708 = vcosq.f32 %v1041_v4  ;;  %v3591_v38 = vsub.s32 %v1117_v42, %v1120_v21  ;;  %v1198_v10 = vsel %vm1196_vm3, %v1186_v43, 2102212464  ;;  %v1205_v7 = vsel %vm1193_vm10, %v1183_v34, %v1186_v43 }
 0x12a   : > { %2710 = vsinq.f32 %v1041_v4  ;;  %v1204_v37 = vsel %vm1194_vm15, %v1201_v15, %v1203_v32  ;;  %v1207_v54 = vsel %vm1195_vm14, %v3143_v16, %v3169_v3  ;;  %v1209_v29 = vshll.u32 %v1169_v60, 8 }
 0x12b   : > { %v1047_v30 = vand.u32 3, %v1046_v18  ;;  %v1875_v61 = vand.u32 3, %v1042_v2  ;;  %v1123_v35 = vsub.s32 0, %v3591_v38  ;;  %v1208_v26 = vsel %vm1194_vm15, %v1205_v7, %v1207_v54 }
 0x12c   : > { %v1197_v40 = vsel %vm1193_vm10, %v1177_v44, %v1180_v57  ;;  %v1199_v56 = vsel %vm1195_vm14, %v1183_v34, %v1198_v10  ;;  %v3610_v33 = vmul.u32.u64.low %v1209_v29, %v1208_v26  ;;  %v3611_v14 = vmul.u32.u64.high %v1209_v29, %v1208_v26, %v3610_v33  ;;  %v4322_v57 = vld [vmem:[#allocation13_spill] sm:$0xff] }
 0x12d   : > { %v4319_v42 = vmov 920167782   ;;  %v2548_v3 = vmin.u32 %v1123_v35, %v3591_v38  ;;  %v3618_v2 = vmul.u32.u64.low %v1209_v29, %v1204_v37  ;;  %v3619_v18 = vmul.u32.u64.high %v1209_v29, %v1204_v37, %v3618_v2 }
 0x12e   : > { %v3615_v16 = vshll.u32 %v4319_v42, %v3194_v58  ;;  %v1400_v1 = vor.u32 %v4321_v45, %v4320_v6  ;;  %vm1404_vm3 = vcmp.lt.s32.totalorder %v4322_v57, 4  ;;  %v3626_v34 = vshrl.u32 %v4323_v48, 5 }
 0x12f   : > { %v3630_v60 = vor.u32 %v4325_v24, %v4324_v59  ;;  %v3635_v0 = vsel %vm1404_vm3, %v3465_v11, 920167782  ;;  %v1125_v43 = vclz %v2548_v3  ;;  %v1200_v53 = vsel %vm1194_vm15, %v1197_v40, %v1199_v56 }
 0x130   : > { %v1296_v55 = vor.u32 %v3469_v36, %v3615_v16  ;;  %vm1045_vm13 = vweird.f32 %v2893_v31  ;;  %vm1048_vm9 = vcmp.lt.s32.totalorder %v1047_v30, 2  ;;  %vm1876_vm0 = vcmp.lt.s32.totalorder %v1875_v61, 2 }
 0x131   : > { %vm1877_vm5 = vcmp.eq.s32.totalorder %v1875_v61, 0  ;;  %vm1880_vm4 = vcmp.eq.s32.totalorder %v1875_v61, 2  ;;  %vm1049_vm7 = vcmp.eq.s32.totalorder %v1047_v30, 0  ;;  %vm1059_vm1 = vcmp.lt.s32.totalorder %v2906_v51, 0 }
 0x132   : > { %v2549_v12 = vadd.s32 4294967294, %v1125_v43  ;;  %vm1218_vm2 = vc.u32 %v3611_v14, %v3618_v2  ;;  %v1219_v23 = vadd.s32 1, %v3619_v18  ;;  %vm1052_vm6 = vcmp.eq.s32.totalorder %v1047_v30, 2 }
 0x133   : > { %v1113_v63 = vadd.s32 %v3516_v13, %v3514_v47  ;;  %v1143_v36 = vsub.s32 4, %v3563_v62  ;;  %v1216_v49 = vmul.u32 %v1209_v29, %v1200_v53  ;;  %v2709_v5 = vpop.eup %2708  ;;  %vm1300_vm8 = vcmp.lt.s32.totalorder %v3626_v34, 4 }
 0x134   : > { %vm2550_vm11 = vcmp.lt.s32.totalorder %v2549_v12, 0  ;;  %v1220_v15 = vsel %vm1218_vm2, %v1219_v23, %v3619_v18  ;;  %v1265_v22 = vand.u32 2147483647, %v4326_v39  ;;  %v1282_v21 = vshll.u32 %v4292_v41, %v3194_v58  ;;  %v2711_v4 = vpop.eup %2710 }
 0x135   : > { %v1053_v44 = vxor.u32 2147483648, %v2709_v5  ;;  %v1128_v32 = vsel %vm2550_vm11, 0, %v2549_v12  ;;  %v1221_v10 = vadd.s32 %v1220_v15, %v1216_v49  ;;  %v1283_v47 = vshrl.u32 %v4293_v19, %v3223_v27 }
 0x136   : > { %v1050_v13 = vxor.u32 2147483648, %v2711_v4  ;;  %v1129_v7 = vsub.s32 32, %v1128_v32  ;;  %v1133_v37 = vsub.s32 4294967266, %v1128_v32  ;;  %v1286_v54 = vshrl.u32 %v4294_v25, %v3223_v27 }
 0x137   : > { %v1054_v29 = vsel %vm1052_vm6, %v1053_v44, %v2711_v4  ;;  %v1882_v35 = vsel %vm1880_vm4, %v1053_v44, %v2711_v4  ;;  %v1130_v26 = vshll.u32 %v3591_v38, %v1128_v32  ;;  %v1222_v40 = vadd.s32 536870912, %v1221_v10 }
 0x138   : > { %v1051_v56 = vsel %vm1049_vm7, %v2709_v5, %v1050_v13  ;;  %v1879_v33 = vsel %vm1877_vm5, %v2709_v5, %v1050_v13  ;;  %v1131_v16 = vshrl.u32 %v1113_v63, %v1129_v7  ;;  %v1134_v3 = vadd.s32 127, %v1133_v37 }
 0x139   : > { %v1055_v18 = vsel %vm1048_vm9, %v1051_v56, %v1054_v29  ;;  %v1883_v48 = vsel %vm1876_vm0, %v1879_v33, %v1882_v35  ;;  %v3665_v59 = vshrl.u32 %v1222_v40, 30  ;;  %v1285_v24 = vshll.u32 %v4293_v19, %v3194_v58 }
 0x13a   : > { %v3671_v43 = vsel %vm1045_vm13, nan, %v1055_v18  ;;  %v1884_v38 = vsel %vm1045_vm13, nan, %v1883_v48  ;;  %v1132_v53 = vor.u32 %v1131_v16, %v1130_v26  ;;  %v1135_v12 = vshll.u32 %v1134_v3, 23 }
 0x13b   : > { %2311 = vrot.lane.b32.xlu1 %v1884_v38, %s2807_s22  ;;  %v1144_v30 = vsel %vm1059_vm1, %v1143_v36, %v3563_v62  ;;  %v1224_v61 = vshll.u32 %v3665_v59, 30  ;;  %v1288_v23 = vshll.u32 %v4294_v25, %v3194_v58  ;;  %v1289_v63 = vshrl.u32 %v4295_v46, %v3223_v27 }
 0x13c   : > { %v1136_v49 = vor.u32 4788187, %v1135_v12  ;;  %v1272_v31 = vand.u32 8388607, %v1265_v22  ;;  %v1284_v5 = vor.u32 %v1283_v47, %v1282_v21  ;;  %v1287_v15 = vor.u32 %v1286_v54, %v1285_v24 }
 0x13d   : > { %v1306_v4 = vsel %vm1300_vm8, %v3630_v60, 920167782  ;;  %vm3691_vm12 = vcmp.le.f32.partialorder %v1057_v52, 0.7853982  ;;  %v3695_v58 = vsub.s32 %v1221_v10, %v1224_v61  ;;  %v1290_v36 = vor.u32 %v1289_v63, %v1288_v23  ;;  %v4329_v61 = vld [vmem:[#allocation8_spill] sm:$0xff] }
 0x13e   : > { %v1310_v44 = vsel %vm1300_vm8, %v1296_v55, 1326507024  ;;  %v1137_v32 = vand.u32 2147483647, %v1136_v49  ;;  %v1139_v13 = vcvt.s32.f32 %v1132_v53  ;;  %v1146_v21 = vsel %vm3691_vm12, 0, %v1144_v30 }
 0x13f   : > { %v1227_v47 = vsub.s32 0, %v3695_v58  ;;  %v1281_v7 = vshrl.u32 %v4292_v41, %v3223_v27  ;;  %vm1297_vm10 = vcmp.lt.s32.totalorder %v3626_v34, 1  ;;  %v1302_v52 = vsel %vm1300_vm8, %v1290_v36, 2102212464 }
 0x140   : > { %v1140_v10 = vmul.f32 %v1139_v13, %v1137_v32  ;;  %v1273_v37 = vor.u32 8388608, %v1272_v31  ;;  %vm1299_vm14 = vcmp.lt.s32.totalorder %v3626_v34, 3  ;;  %v1305_v55 = vsel %vm1297_vm10, %v1284_v5, %v1287_v15 }
 0x141   : > { %v2552_v54 = vmin.u32 %v1227_v47, %v3695_v58  ;;  %v1307_v29 = vsel %vm1299_vm14, %v1290_v36, %v1306_v4  ;;  %v1309_v35 = vsel %vm1297_vm10, %v1287_v15, %v1290_v36  ;;  %v1311_v26 = vsel %vm1299_vm14, %v3630_v60, %v1310_v44  ;;  %v4333_v47 = vld [vmem:[#allocation12_spill] sm:$0xff] }
 0x142   : > { %v3715_v27 = vsel %vm1404_vm3, %v1400_v1, 1326507024  ;;  %v1141_v40 = vxor.u32 2147483648, %v1140_v10  ;;  %v1301_v56 = vsel %vm1297_vm10, %v1281_v7, %v1284_v5  ;;  %v1303_v33 = vsel %vm1299_vm14, %v1287_v15, %v1302_v52 }
 0x143   : > { %v1150_v16 = vadd.s32 3, %v1146_v21  ;;  %v3717_v3 = vand.u32 3, %v1146_v21  ;;  %v1229_v18 = vclz %v2552_v54  ;;  %vm1298_vm15 = vcmp.lt.s32.totalorder %v3626_v34, 2  ;;  %v4332_v21 = vld [vmem:[#allocation14_spill] sm:$0xff] }
 0x144   : > { %v1142_v48 = vsel %vm1059_vm1, %v1141_v40, %v1140_v10  ;;  %v1308_v60 = vsel %vm1298_vm15, %v1305_v55, %v1307_v29  ;;  %v1312_v24 = vsel %vm1298_vm15, %v1309_v35, %v1311_v26  ;;  %v1313_v38 = vshll.u32 %v1273_v37, 8 }
 0x145   : > { %v1145_v6 = vsel %vm3691_vm12, %v2906_v51, %v1142_v48  ;;  %v2553_v45 = vadd.s32 4294967294, %v1229_v18  ;;  %v1247_v1 = vsub.s32 4, %v3665_v59  ;;  %v1304_v53 = vsel %vm1298_vm15, %v1301_v56, %v1303_v33 }
 0x146   : > { %2712 = vcosq.f32 %v1145_v6  ;;  %v3726_v12 = vmul.u32.u64.low %v1313_v38, %v1312_v24  ;;  %v3727_v30 = vmul.u32.u64.high %v1313_v38, %v1312_v24, %v3726_v12  ;;  %v1369_v34 = vand.u32 2147483647, %v4329_v61 }
 0x147   : > { %2714 = vsinq.f32 %v1145_v6  ;;  %vm2554_vm13 = vcmp.lt.s32.totalorder %v2553_v45, 0  ;;  %v3730_v23 = vmul.u32.u64.low %v1313_v38, %v1308_v60  ;;  %v3731_v63 = vmul.u32.u64.high %v1313_v38, %v1308_v60, %v3730_v23 }
 0x148   : > { %v3734_v49 = vand.u32 3, %v1150_v16  ;;  %vm3738_vm9 = vcmp.le.f32.partialorder %v1161_v20, 0.7853982  ;;  %vm1163_vm0 = vcmp.lt.s32.totalorder %v2903_v50, 0  ;;  %v1232_v5 = vsel %vm2554_vm13, 0, %v2553_v45 }
 0x149   : > { %v1217_v15 = vadd.s32 %v3618_v2, %v3611_v14  ;;  %v1233_v4 = vsub.s32 32, %v1232_v5  ;;  %v1237_v62 = vsub.s32 4294967266, %v1232_v5  ;;  %v1248_v36 = vsel %vm1163_vm0, %v1247_v1, %v3665_v59 }
 0x14a   : > { %vm1983_vm5 = vcmp.eq.s32.totalorder %v3717_v3, 2  ;;  %v1234_v44 = vshll.u32 %v3695_v58, %v1232_v5  ;;  %v1320_v20 = vmul.u32 %v1313_v38, %v1304_v53  ;;  %vm1322_vm4 = vc.u32 %v3727_v30, %v3730_v23 }
 0x14b   : > { %v1376_v32 = vand.u32 8388607, %v1369_v34  ;;  %vm1980_vm7 = vcmp.eq.s32.totalorder %v3717_v3, 0  ;;  %v1235_v14 = vshrl.u32 %v1217_v15, %v1233_v4  ;;  %v1238_v2 = vadd.s32 127, %v1237_v62 }
 0x14c   : > { %v1323_v13 = vadd.s32 1, %v3731_v63  ;;  %v1387_v59 = vshrl.u32 %v4293_v19, %v4332_v21  ;;  %vm1979_vm1 = vcmp.lt.s32.totalorder %v3717_v3, 2  ;;  %v1389_v58 = vshll.u32 %v4293_v19, %v4333_v47 }
 0x14d   : > { %v1390_v7 = vshrl.u32 %v4294_v25, %v4332_v21  ;;  %v1392_v52 = vshll.u32 %v4294_v25, %v4333_v47  ;;  %v1393_v10 = vshrl.u32 %v4295_v46, %v4332_v21  ;;  %vm1149_vm2 = vweird.f32 %v2906_v51 }
 0x14e   : > { %vm1152_vm6 = vcmp.lt.s32.totalorder %v3734_v49, 2  ;;  %v1236_v37 = vor.u32 %v1235_v14, %v1234_v44  ;;  %v1239_v55 = vshll.u32 %v1238_v2, 23  ;;  %v1324_v54 = vsel %vm1322_vm4, %v1323_v13, %v3731_v63 }
 0x14f   : > { %v1325_v29 = vadd.s32 %v1324_v54, %v1320_v20  ;;  %v1386_v35 = vshll.u32 %v4292_v41, %v4333_v47  ;;  %v1391_v26 = vor.u32 %v1390_v7, %v1389_v58  ;;  %v1394_v40 = vor.u32 %v1393_v10, %v1392_v52 }
 0x150   : > { %vm1153_vm8 = vcmp.eq.s32.totalorder %v3734_v49, 0  ;;  %vm1156_vm11 = vcmp.eq.s32.totalorder %v3734_v49, 2  ;;  %v1240_v56 = vor.u32 4788187, %v1239_v55  ;;  %v1250_v33 = vsel %vm3738_vm9, 0, %v1248_v36  ;;  %v2713_v16 = vpop.eup %2712 }
 0x151   : > { %v1326_v18 = vadd.s32 536870912, %v1325_v29  ;;  %v1377_v48 = vor.u32 8388608, %v1376_v32  ;;  %v1388_v60 = vor.u32 %v1387_v59, %v1386_v35  ;;  %vm1401_vm12 = vcmp.lt.s32.totalorder %v4322_v57, 1  ;;  %v2715_v24 = vpop.eup %2714 }
 0x152   : > { %v1157_v38 = vxor.u32 2147483648, %v2713_v16  ;;  %v1241_v6 = vand.u32 2147483647, %v1240_v56  ;;  %v1243_v45 = vcvt.s32.f32 %v1236_v37  ;;  %vm1402_vm10 = vcmp.lt.s32.totalorder %v4322_v57, 2 }
 0x153   : > { %v1154_v1 = vxor.u32 2147483648, %v2715_v24  ;;  %v3781_v53 = vshrl.u32 %v1326_v18, 30  ;;  %vm1403_vm14 = vcmp.lt.s32.totalorder %v4322_v57, 3  ;;  %v1413_v12 = vsel %vm1401_vm12, %v1391_v26, %v1394_v40  ;;  %v4337_v57 = vld [vmem:[#allocation7_spill] sm:$0xff] }
 0x154   : > { %v1985_v63 = vsel %vm1983_vm5, %v1157_v38, %v2715_v24  ;;  %v1158_v5 = vsel %vm1156_vm11, %v1157_v38, %v2715_v24  ;;  %v1244_v15 = vmul.f32 %v1243_v45, %v1241_v6  ;;  %v1415_v4 = vsel %vm1403_vm14, %v3465_v11, %v3715_v27 }
 0x155   : > { %v1982_v62 = vsel %vm1980_vm7, %v2713_v16, %v1154_v1  ;;  %v1155_v36 = vsel %vm1153_vm8, %v2713_v16, %v1154_v1  ;;  %v1328_v44 = vshll.u32 %v3781_v53, 30  ;;  %v1409_v20 = vsel %vm1401_vm12, %v1388_v60, %v1391_v26 }
 0x156   : > { %v1986_v32 = vsel %vm1979_vm1, %v1982_v62, %v1985_v63  ;;  %v1159_v14 = vsel %vm1152_vm6, %v1155_v36, %v1158_v5  ;;  %v1245_v2 = vxor.u32 2147483648, %v1244_v15  ;;  %v1411_v11 = vsel %vm1403_vm14, %v1394_v40, %v3635_v0 }
 0x157   : > { %v1987_v27 = vsel %vm1149_vm2, nan, %v1986_v32  ;;  %v3812_v13 = vsel %vm1149_vm2, nan, %v1159_v14  ;;  %v3814_v59 = vsub.s32 %v1325_v29, %v1328_v44  ;;  %v1416_v3 = vsel %vm1402_vm10, %v1413_v12, %v1415_v4 }
 0x158   : > { %2313 = vrot.lane.b32.xlu0 %v1987_v27, %s2807_s22  ;;  %v1246_v49 = vsel %vm1163_vm0, %v1245_v2, %v1244_v15  ;;  %v1254_v47 = vadd.s32 3, %v1250_v33  ;;  %v1406_v0 = vsel %vm1404_vm3, %v1394_v40, 2102212464  ;;  %v1417_v58 = vshll.u32 %v1377_v48, 8  ;;  %v4334_v48 = vld [vmem:[#allocation5_spill] sm:$0xff] }
 0x159   : > { %v1249_v51 = vsel %vm3738_vm9, %v2903_v50, %v1246_v49  ;;  %v1331_v7 = vsub.s32 0, %v3814_v59  ;;  %v1385_v52 = vshrl.u32 %v4292_v41, %v4332_v21  ;;  %v1412_v10 = vsel %vm1402_vm10, %v1409_v20, %v1411_v11 }
 0x15a   : > { %2716 = vcosq.f32 %v1249_v51  ;;  %v3831_v37 = vmul.u32.u64.low %v1417_v58, %v1416_v3  ;;  %v3832_v55 = vmul.u32.u64.high %v1417_v58, %v1416_v3, %v3831_v37  ;;  %v1407_v31 = vsel %vm1403_vm14, %v1391_v26, %v1406_v0 }
 0x15b   : > { %2718 = vsinq.f32 %v1249_v51  ;;  %v2556_v54 = vmin.u32 %v1331_v7, %v3814_v59  ;;  %v1405_v29 = vsel %vm1401_vm12, %v1385_v52, %v1388_v60  ;;  %v2081_v35 = vand.u32 3, %v1250_v33 }
 0x15c   : > { %v3839_v40 = vmul.u32.u64.low %v1417_v58, %v1412_v10  ;;  %v3840_v56 = vmul.u32.u64.high %v1417_v58, %v1412_v10, %v3839_v40  ;;  %v1255_v21 = vand.u32 3, %v1254_v47  ;;  %vm1267_vm3 = vcmp.lt.s32.totalorder %v4326_v39, 0 }
 0x15d   : > { %v1333_v16 = vclz %v2556_v54  ;;  %v1408_v18 = vsel %vm1402_vm10, %v1405_v29, %v1407_v31  ;;  %v124_v24 = vcvt.s32.f32 %v4334_v48  ;;  %vm3849_vm15 = vcmp.le.f32.partialorder %v1265_v22, 0.7853982 }
 0x15e   : > { %v1351_v33 = vsub.s32 4, %v3781_v53  ;;  %vm1426_vm13 = vc.u32 %v3832_v55, %v3839_v40  ;;  %vm2082_vm9 = vcmp.lt.s32.totalorder %v2081_v35, 2  ;;  %vm2083_vm0 = vcmp.eq.s32.totalorder %v2081_v35, 0 }
 0x15f   : > { %v2557_v26 = vadd.s32 4294967294, %v1333_v16  ;;  %v1427_v38 = vadd.s32 1, %v3840_v56  ;;  %v3858_v6 = vmul.f32 %v4337_v57, %v124_v24  ;;  %vm1253_vm5 = vweird.f32 %v2903_v50 }
 0x160   : > { %vm1256_vm4 = vcmp.lt.s32.totalorder %v1255_v21, 2  ;;  %vm2086_vm7 = vcmp.eq.s32.totalorder %v2081_v35, 2  ;;  %v1424_v22 = vmul.u32 %v1417_v58, %v1408_v18  ;;  %vm1257_vm2 = vcmp.eq.s32.totalorder %v1255_v21, 0 }
 0x161   : > { %vm2558_vm1 = vcmp.lt.s32.totalorder %v2557_v26, 0  ;;  %v1321_v45 = vadd.s32 %v3730_v23, %v3727_v30  ;;  %v1428_v12 = vsel %vm1426_vm13, %v1427_v38, %v3840_v56  ;;  %v1352_v15 = vsel %vm1267_vm3, %v1351_v33, %v3781_v53 }
 0x162   : > { %v1336_v1 = vsel %vm2558_vm1, 0, %v2557_v26  ;;  %v1429_v4 = vadd.s32 %v1428_v12, %v1424_v22  ;;  %vm1260_vm6 = vcmp.eq.s32.totalorder %v1255_v21, 2  ;;  %v128_v44 = vand.u32 2147483647, %v3858_v6 }
 0x163   : > { %v1337_v63 = vsub.s32 32, %v1336_v1  ;;  %v1341_v5 = vsub.s32 4294967266, %v1336_v1  ;;  %v1338_v36 = vshll.u32 %v3814_v59, %v1336_v1  ;;  %v131_v20 = vand.u32 2139095040, %v3858_v6 }
 0x164   : > { %v2717_v62 = vpop.eup %2716  ;;  %v1430_v2 = vadd.s32 536870912, %v1429_v4  ;;  %v1354_v27 = vsel %vm3849_vm15, 0, %v1352_v15  ;;  %v123_v53 = vadd.s32 8, %v4334_v48  ;;  %v135_v29 = vand.u32 8388607, %v128_v44 }
 0x165   : > { %v2719_v32 = vpop.eup %2718  ;;  %v1261_v30 = vxor.u32 2147483648, %v2717_v62  ;;  %v1339_v23 = vshrl.u32 %v1321_v45, %v1337_v63  ;;  %v1342_v14 = vadd.s32 127, %v1341_v5  ;;  %v132_v3 = vshrl.u32 %v131_v20, 23 }
 0x166   : > { %v1258_v11 = vxor.u32 2147483648, %v2719_v32  ;;  %v1431_v7 = vshrl.u32 %v1430_v2, 30  ;;  %v125_v24 = vcvt.s32.f32 %v123_v53  ;;  %v1358_v35 = vadd.s32 3, %v1354_v27 }
 0x167   : > { %v1262_v49 = vsel %vm1260_vm6, %v1261_v30, %v2719_v32  ;;  %v2088_v47 = vsel %vm2086_vm7, %v1261_v30, %v2719_v32  ;;  %v1340_v59 = vor.u32 %v1339_v23, %v1338_v36  ;;  %v1343_v0 = vshll.u32 %v1342_v14, 23 }
 0x168   : > { %v1259_v58 = vsel %vm1257_vm2, %v2717_v62, %v1258_v11  ;;  %v2085_v51 = vsel %vm2083_vm0, %v2717_v62, %v1258_v11  ;;  %v2515_v52 = vadd.s32 4294967169, %v132_v3  ;;  %v1432_v16 = vshll.u32 %v1431_v7, 30 }
 0x169   : > { %v1263_v10 = vsel %vm1256_vm4, %v1259_v58, %v1262_v49  ;;  %v2089_v37 = vsel %vm2082_vm9, %v2085_v51, %v2088_v47  ;;  %v1344_v54 = vor.u32 4788187, %v1343_v0  ;;  %v1347_v48 = vcvt.s32.f32 %v1340_v59 }
 0x16a   : > { %v3882_v31 = vsel %vm1253_vm5, nan, %v1263_v10  ;;  %v2090_v56 = vsel %vm1253_vm5, nan, %v2089_v37  ;;  %v138_v21 = vadd.s32 1, %v2515_v52  ;;  %v3887_v26 = vsub.s32 %v1429_v4, %v1432_v16 }
 0x16b   : > { %2315 = vrot.lane.b32.xlu1 %v2090_v56, %s2807_s22  ;;  %v1345_v18 = vand.u32 2147483647, %v1344_v54  ;;  %v136_v38 = vor.u32 8388608, %v135_v29  ;;  %v1455_v45 = vsub.s32 4, %v1431_v7  ;;  %v3891_v63 = vmul.f32 %v4337_v57, %v125_v24 }
 0x16c   : > { %vm139_vm8 = vcmp.gt.s32.totalorder %v138_v21, 0  ;;  %v1435_v22 = vsub.s32 0, %v3887_v26  ;;  %v3893_v5 = vand.u32 3, %v1358_v35  ;;  %v3895_v15 = vand.u32 3, %v1354_v27 }
 0x16d   : > { %v1348_v33 = vmul.f32 %v1347_v48, %v1345_v18  ;;  %v140_v1 = vsel %vm139_vm8, %v138_v21, 0  ;;  %vm1371_vm11 = vcmp.lt.s32.totalorder %v4329_v61, 0  ;;  %v1425_v36 = vadd.s32 %v3839_v40, %v3832_v55 }
 0x16e   : > { %v142_v50 = vand.u32 31, %v140_v1  ;;  %v2560_v4 = vmin.u32 %v1435_v22, %v3887_v26  ;;  %v3903_v32 = vshll.u32 %v136_v38, 8  ;;  %v1456_v23 = vsel %vm1371_vm11, %v1455_v45, %v1431_v7 }
 0x16f   : > { %v1349_v12 = vxor.u32 2147483648, %v1348_v33  ;;  %v141_v2 = vshrl.u32 %v140_v1, 5  ;;  %v235_v27 = vand.u32 2139095040, %v3891_v63  ;;  %vm3915_vm12 = vcmp.le.f32.partialorder %v1369_v34, 0.7853982 }
 0x170   : > { %v143_v20 = vsub.s32 32, %v142_v50  ;;  %v1437_v30 = vclz %v2560_v4  ;;  %v145_v14 = vshll.u32 %v4292_v41, %v142_v50  ;;  %v148_v60 = vshll.u32 %v4293_v19, %v142_v50 }
 0x171   : > { %v1350_v62 = vsel %vm1267_vm3, %v1349_v12, %v1348_v33  ;;  %v151_v49 = vshll.u32 %v4294_v25, %v142_v50  ;;  %v154_v59 = vshll.u32 %v4295_v46, %v142_v50  ;;  %v157_v58 = vshll.u32 %v4319_v42, %v142_v50 }
 0x172   : > { %v1353_v57 = vsel %vm3849_vm15, %v4326_v39, %v1350_v62  ;;  %v146_v11 = vshrl.u32 %v4293_v19, %v143_v20  ;;  %v2561_v40 = vadd.s32 4294967294, %v1437_v30  ;;  %v149_v3 = vshrl.u32 %v4294_v25, %v143_v20 }
 0x173   : > { %2720 = vcosq.f32 %v1353_v57  ;;  %v144_v53 = vshrl.u32 %v4292_v41, %v143_v20  ;;  %v152_v47 = vshrl.u32 %v4295_v46, %v143_v20  ;;  %v155_v34 = vshrl.u32 %v4319_v42, %v143_v20 }
 0x174   : > { %2722 = vsinq.f32 %v1353_v57  ;;  %vm2562_vm10 = vcmp.lt.s32.totalorder %v2561_v40, 0  ;;  %v147_v0 = vor.u32 %v146_v11, %v145_v14  ;;  %vm1364_vm14 = vcmp.eq.s32.totalorder %v3893_v5, 2 }
 0x175   : > { %vm2189_vm3 = vcmp.eq.s32.totalorder %v3895_v15, 2  ;;  %v1440_v51 = vsel %vm2562_vm10, 0, %v2561_v40  ;;  %v150_v7 = vor.u32 %v149_v3, %v148_v60  ;;  %v153_v52 = vor.u32 %v152_v47, %v151_v49 }
 0x176   : > { %v158_v10 = vshrl.u32 %v4306_v17, %v143_v20  ;;  %vm1361_vm15 = vcmp.eq.s32.totalorder %v3893_v5, 0  ;;  %vm2186_vm13 = vcmp.eq.s32.totalorder %v3895_v15, 0  ;;  %v1441_v37 = vsub.s32 32, %v1440_v51 }
 0x177   : > { %v1445_v54 = vsub.s32 4294967266, %v1440_v51  ;;  %v156_v29 = vor.u32 %v155_v34, %v154_v59  ;;  %vm160_vm9 = vcmp.lt.s32.totalorder %v141_v2, 1  ;;  %vm1360_vm0 = vcmp.lt.s32.totalorder %v3893_v5, 2 }
 0x178   : > { %vm2185_vm5 = vcmp.lt.s32.totalorder %v3895_v15, 2  ;;  %v1442_v56 = vshll.u32 %v3887_v26, %v1440_v51  ;;  %v159_v16 = vor.u32 %v158_v10, %v157_v58  ;;  %vm162_vm4 = vcmp.lt.s32.totalorder %v141_v2, 3 }
 0x179   : > { %vm163_vm7 = vcmp.lt.s32.totalorder %v141_v2, 4  ;;  %vm1357_vm1 = vweird.f32 %v4326_v39  ;;  %v1443_v18 = vshrl.u32 %v1425_v36, %v1441_v37  ;;  %v1446_v48 = vadd.s32 127, %v1445_v54 }
 0x17a   : > { %vm161_vm2 = vcmp.lt.s32.totalorder %v141_v2, 2  ;;  %v165_v21 = vsel %vm163_vm7, %v153_v52, 2102212464  ;;  %v164_v24 = vsel %vm160_vm9, %v144_v53, %v147_v0  ;;  %v168_v33 = vsel %vm160_vm9, %v147_v0, %v150_v7 }
 0x17b   : > { %v166_v35 = vsel %vm162_vm4, %v150_v7, %v165_v21  ;;  %v169_v38 = vsel %vm163_vm7, %v156_v29, 920167782  ;;  %v1444_v22 = vor.u32 %v1443_v18, %v1442_v56  ;;  %v1447_v26 = vshll.u32 %v1446_v48, 23 }
 0x17c   : > { %v170_v45 = vsel %vm162_vm4, %v153_v52, %v169_v38  ;;  %v172_v1 = vsel %vm160_vm9, %v150_v7, %v153_v52  ;;  %v1458_v50 = vsel %vm3915_vm12, 0, %v1456_v23  ;;  %v173_v62 = vsel %vm163_vm7, %v159_v16, 1326507024 }
 0x17d   : > { %v2721_v12 = vpop.eup %2720  ;;  %v171_v4 = vsel %vm161_vm2, %v168_v33, %v170_v45  ;;  %v236_v36 = vshrl.u32 %v235_v27, 23  ;;  %v1448_v30 = vor.u32 4788187, %v1447_v26  ;;  %v167_v14 = vsel %vm161_vm2, %v164_v24, %v166_v35 }
 0x17e   : > { %v2723_v20 = vpop.eup %2722  ;;  %v1365_v57 = vxor.u32 2147483648, %v2721_v12  ;;  %v174_v11 = vsel %vm162_vm4, %v156_v29, %v173_v62  ;;  %v3951_v3 = vmul.u32.u64.low %v3903_v32, %v171_v4  ;;  %v3952_v53 = vmul.u32.u64.high %v3903_v32, %v171_v4, %v3951_v3 }
 0x17f   : > { %v1362_v40 = vxor.u32 2147483648, %v2723_v20  ;;  %v175_v60 = vsel %vm161_vm2, %v172_v1, %v174_v11  ;;  %v1449_v49 = vand.u32 2147483647, %v1448_v30  ;;  %v1451_v47 = vcvt.s32.f32 %v1444_v22 }
 0x180   : > { %v2191_v23 = vsel %vm2189_vm3, %v1365_v57, %v2723_v20  ;;  %v1366_v27 = vsel %vm1364_vm14, %v1365_v57, %v2723_v20  ;;  %v3964_v0 = vmul.u32.u64.low %v3903_v32, %v175_v60  ;;  %v3965_v34 = vmul.u32.u64.high %v3903_v32, %v175_v60, %v3964_v0 }
 0x181   : > { %v2188_v59 = vsel %vm2186_vm13, %v2721_v12, %v1362_v40  ;;  %v1363_v2 = vsel %vm1361_vm15, %v2721_v12, %v1362_v40  ;;  %v1452_v7 = vmul.f32 %v1451_v47, %v1449_v49  ;;  %v2519_v52 = vadd.s32 4294967169, %v236_v36 }
 0x182   : > { %v2192_v58 = vsel %vm2185_vm5, %v2188_v59, %v2191_v23  ;;  %v1367_v51 = vsel %vm1360_vm0, %v1363_v2, %v1366_v27  ;;  %v183_v54 = vmul.u32 %v3903_v32, %v167_v14  ;;  %v186_v29 = vadd.s32 1, %v3952_v53 }
 0x183   : > { %v2193_v10 = vsel %vm1357_vm1, nan, %v2192_v58  ;;  %v3975_v37 = vsel %vm1357_vm1, nan, %v1367_v51  ;;  %v1453_v15 = vxor.u32 2147483648, %v1452_v7  ;;  %v242_v56 = vadd.s32 1, %v2519_v52 }
 0x184   : > { %2317 = vrot.lane.b32.xlu0 %v2193_v10, %s2807_s22  ;;  %vm185_vm6 = vc.u32 %v3965_v34, %v3951_v3  ;;  %v232_v5 = vand.u32 2147483647, %v3891_v63  ;;  %v1462_v18 = vadd.s32 3, %v1458_v50  ;;  %v2287_v38 = vand.u32 3, %v1458_v50 }
 0x185   : > { %v1454_v16 = vsel %vm1371_vm11, %v1453_v15, %v1452_v7  ;;  %v187_v39 = vsel %vm185_vm6, %v186_v29, %v3952_v53  ;;  %vm243_vm8 = vcmp.gt.s32.totalorder %v242_v56, 0  ;;  %vm1461_vm3 = vweird.f32 %v4329_v61 }
 0x186   : > { %v1457_v32 = vsel %vm3915_vm12, %v4329_v61, %v1454_v16  ;;  %v188_v48 = vadd.s32 %v187_v39, %v183_v54  ;;  %v244_v21 = vsel %vm243_vm8, %v242_v56, 0  ;;  %v1463_v33 = vand.u32 3, %v1462_v18 }
 0x187   : > { %2724 = vcosq.f32 %v1457_v32  ;;  %v246_v24 = vand.u32 31, %v244_v21  ;;  %v239_v22 = vand.u32 8388607, %v232_v5  ;;  %v3993_v1 = vshrl.u32 %v244_v21, 5 }
 0x188   : > { %2726 = vsinq.f32 %v1457_v32  ;;  %v189_v35 = vadd.s32 536870912, %v188_v48  ;;  %vm1464_vm11 = vcmp.lt.s32.totalorder %v1463_v33, 2  ;;  %vm2288_vm12 = vcmp.lt.s32.totalorder %v2287_v38, 2 }
 0x189   : > { %v247_v26 = vsub.s32 32, %v246_v24  ;;  %v249_v12 = vshll.u32 %v4292_v41, %v246_v24  ;;  %v252_v4 = vshll.u32 %v4293_v19, %v246_v24  ;;  %v255_v62 = vshll.u32 %v4294_v25, %v246_v24 }
 0x18a   : > { %v3991_v45 = vshrl.u32 %v189_v35, 30  ;;  %v258_v36 = vshll.u32 %v4295_v46, %v246_v24  ;;  %vm2289_vm10 = vcmp.eq.s32.totalorder %v2287_v38, 0  ;;  %vm2292_vm14 = vcmp.eq.s32.totalorder %v2287_v38, 2 }
 0x18b   : > { %v250_v55 = vshrl.u32 %v4293_v19, %v247_v26  ;;  %v253_v20 = vshrl.u32 %v4294_v25, %v247_v26  ;;  %v256_v57 = vshrl.u32 %v4295_v46, %v247_v26  ;;  %v259_v30 = vshrl.u32 %v4319_v42, %v247_v26 }
 0x18c   : > { %v191_v50 = vshll.u32 %v3991_v45, 30  ;;  %v240_v14 = vor.u32 8388608, %v239_v22  ;;  %vm1465_vm15 = vcmp.eq.s32.totalorder %v1463_v33, 0  ;;  %v261_v11 = vshll.u32 %v4319_v42, %v246_v24 }
 0x18d   : > { %v262_v40 = vshrl.u32 %v4306_v17, %v247_v26  ;;  %vm1468_vm13 = vcmp.eq.s32.totalorder %v1463_v33, 2  ;;  %v248_v25 = vshrl.u32 %v4292_v41, %v247_v26  ;;  %v251_v60 = vor.u32 %v250_v55, %v249_v12 }
 0x18e   : > { %v192_v19 = vsub.s32 %v188_v48, %v191_v50  ;;  %v260_v46 = vor.u32 %v259_v30, %v258_v36  ;;  %v254_v23 = vor.u32 %v253_v20, %v252_v4  ;;  %v257_v27 = vor.u32 %v256_v57, %v255_v62 }
 0x18f   : > { %vm267_vm9 = vcmp.lt.s32.totalorder %v3993_v1, 4  ;;  %v184_v47 = vadd.s32 %v3951_v3, %v3965_v34  ;;  %vm264_vm0 = vcmp.lt.s32.totalorder %v3993_v1, 1  ;;  %vm265_vm5 = vcmp.lt.s32.totalorder %v3993_v1, 2 }
 0x190   : > { %v194_v53 = vsub.s32 0, %v192_v19  ;;  %v280_v42 = vshll.u32 %v240_v14, 8  ;;  %v263_v41 = vor.u32 %v262_v40, %v261_v11  ;;  %v269_v0 = vsel %vm267_vm9, %v257_v27, 2102212464 }
 0x191   : > { %v2725_v49 = vpop.eup %2724  ;;  %vm266_vm4 = vcmp.lt.s32.totalorder %v3993_v1, 3  ;;  %v268_v51 = vsel %vm264_vm0, %v248_v25, %v251_v60  ;;  %v273_v3 = vsel %vm267_vm9, %v260_v46, 920167782  ;;  %v272_v10 = vsel %vm264_vm0, %v251_v60, %v254_v23 }
 0x192   : > { %v2727_v17 = vpop.eup %2726  ;;  %v1469_v59 = vxor.u32 2147483648, %v2725_v49  ;;  %v2516_v2 = vmin.u32 %v194_v53, %v192_v19  ;;  %v270_v15 = vsel %vm266_vm4, %v254_v23, %v269_v0  ;;  %v276_v56 = vsel %vm264_vm0, %v254_v23, %v257_v27 }
 0x193   : > { %v1466_v58 = vxor.u32 2147483648, %v2727_v17  ;;  %v274_v32 = vsel %vm266_vm4, %v257_v27, %v273_v3  ;;  %v277_v35 = vsel %vm267_vm9, %v263_v41, 1326507024  ;;  %v271_v62 = vsel %vm265_vm5, %v268_v51, %v270_v15 }
 0x194   : > { %v1470_v34 = vsel %vm1468_vm13, %v1469_v59, %v2727_v17  ;;  %v2294_v7 = vsel %vm2292_vm14, %v1469_v59, %v2727_v17  ;;  %v196_v52 = vclz %v2516_v2  ;;  %v275_v24 = vsel %vm265_vm5, %v272_v10, %v274_v32 }
 0x195   : > { %v1467_v54 = vsel %vm1465_vm15, %v2725_v49, %v1466_v58  ;;  %v2291_v29 = vsel %vm2289_vm10, %v2725_v49, %v1466_v58  ;;  %v278_v33 = vsel %vm266_vm4, %v260_v46, %v277_v35  ;;  %v287_v14 = vmul.u32 %v280_v42, %v271_v62 }
 0x196   : > { %v1471_v16 = vsel %vm1464_vm11, %v1467_v54, %v1470_v34  ;;  %v2295_v18 = vsel %vm2288_vm12, %v2291_v29, %v2294_v7  ;;  %v2517_v39 = vadd.s32 4294967294, %v196_v52  ;;  %v279_v61 = vsel %vm265_vm5, %v276_v56, %v278_v33 }
 0x197   : > { %v4036_v48 = vsel %vm1461_vm3, nan, %v1471_v16  ;;  %v2296_v21 = vsel %vm1461_vm3, nan, %v2295_v18  ;;  %v4047_v38 = vmul.u32.u64.low %v280_v42, %v275_v24  ;;  %v4048_v22 = vmul.u32.u64.high %v280_v42, %v275_v24, %v4047_v38 }
 0x198   : > { %2319 = vrot.lane.b32.xlu1 %v2296_v21, %s2807_s22  ;;  %vm2518_vm7 = vcmp.lt.s32.totalorder %v2517_v39, 0  ;;  %v4054_v36 = vmul.u32.u64.low %v280_v42, %v279_v61  ;;  %v4055_v50 = vmul.u32.u64.high %v280_v42, %v279_v61, %v4054_v36  ;;  %v214_v27 = vsub.s32 4, %v3991_v45 }
 0x199   : > { %v199_v26 = vsel %vm2518_vm7, 0, %v2517_v39  ;;  %v290_v30 = vadd.s32 1, %v4048_v22  ;;  %vm130_vm2 = vcmp.lt.s32.totalorder %v3858_v6, 0  ;;  %vm129_vm6 = vcmp.le.f32.partialorder %v128_v44, 0.7853982  ;;  %v2306_v44 = vpop.permute.xlu0 %2305 }
 0x19a   : > { %v200_v12 = vsub.s32 32, %v199_v26  ;;  %v201_v55 = vshll.u32 %v192_v19, %v199_v26  ;;  %v204_v4 = vsub.s32 4294967266, %v199_v26  ;;  %vm289_vm1 = vc.u32 %v4055_v50, %v4047_v38 }
 0x19b   : > { %v291_v19 = vsel %vm289_vm1, %v290_v30, %v4048_v22  ;;  %v215_v59 = vsel %vm130_vm2, %v214_v27, %v3991_v45  ;;  %vm550_vm11 = vcmask 64512   ;;  %v288_v54 = vadd.s32 %v4047_v38, %v4055_v50 }
 0x19c   : > { %v202_v20 = vshrl.u32 %v184_v47, %v200_v12  ;;  %v205_v57 = vadd.s32 127, %v204_v4  ;;  %v292_v46 = vadd.s32 %v291_v19, %v287_v14  ;;  %v217_v0 = vsel %vm129_vm6, 0, %v215_v59 }
 0x19d   : > { %v221_v51 = vadd.s32 3, %v217_v0  ;;  %v429_v34 = vand.u32 3, %v217_v0  ;;  %vm220_vm15 = vweird.f32 %v3858_v6  ;;  %v2329_v26 = vsel %vm550_vm11, %v3422_v28, %v2306_v44  ;;  %v2310_v62 = vpop.permute.xlu0 %2309 }
 0x19e   : > { %v203_v11 = vor.u32 %v202_v20, %v201_v55  ;;  %v206_v40 = vshll.u32 %v205_v57, 23  ;;  %v293_v1 = vadd.s32 536870912, %v292_v46  ;;  %v4340_v20 = vld [vmem:[#allocation6_spill] sm:$0xff]  ;;  %v2331_v28 = vsel %vm550_vm11, %v3457_v8, %v2310_v62 }
 0x19f   : > { %v222_v52 = vand.u32 3, %v221_v51  ;;  %vm431_vm8 = vcmp.eq.s32.totalorder %v429_v34, 0  ;;  %vm434_vm3 = vcmp.eq.s32.totalorder %v429_v34, 2  ;;  %vm430_vm9 = vcmp.lt.s32.totalorder %v429_v34, 2 }
 0x1a0   : > { %v207_v25 = vor.u32 4788187, %v206_v40  ;;  %v210_v60 = vcvt.s32.f32 %v203_v11  ;;  %v4062_v49 = vshrl.u32 %v293_v1, 30  ;;  %v2357_v57 = vrot.slane %v2329_v26, %v4340_v20 }
 0x1a1   : > { %vm224_vm10 = vcmp.eq.s32.totalorder %v222_v52, 0  ;;  %vm227_vm14 = vcmp.eq.s32.totalorder %v222_v52, 2  ;;  %vm223_vm13 = vcmp.lt.s32.totalorder %v222_v52, 2  ;;  %vm234_vm0 = vcmp.lt.s32.totalorder %v3891_v63, 0 }
 0x1a2   : > { %v208_v53 = vand.u32 2147483647, %v207_v25  ;;  %v295_v42 = vshll.u32 %v4062_v49, 30  ;;  %v318_v25 = vsub.s32 4, %v4062_v49  ;;  %vm233_vm5 = vcmp.le.f32.partialorder %v232_v5, 0.7853982 }
 0x1a4   : > { %v211_v23 = vmul.f32 %v210_v60, %v208_v53  ;;  %v296_v41 = vsub.s32 %v292_v46, %v295_v42  ;;  %v2365_v60 = vrot.slane %v2331_v28, %v4340_v20  ;;  %v319_v46 = vsel %vm234_vm0, %v318_v25, %v4062_v49 }
 0x1a5   : > { %v321_v53 = vsel %vm233_vm5, 0, %v319_v46 }
 0x1a6   : > { %v212_v47 = vxor.u32 2147483648, %v211_v23  ;;  %v298_v58 = vsub.s32 0, %v296_v41  ;;  %v325_v1 = vadd.s32 3, %v321_v53  ;;  %v532_v42 = vand.u32 3, %v321_v53 }
 0x1a8   : > { %v213_v17 = vsel %vm130_vm2, %v212_v47, %v211_v23  ;;  %v2520_v3 = vmin.u32 %v298_v58, %v296_v41  ;;  %v326_v47 = vand.u32 3, %v325_v1  ;;  %vm537_vm7 = vcmp.eq.s32.totalorder %v532_v42, 2 }
 0x1a9   : > { %v216_v2 = vsel %vm129_vm6, %v3858_v6, %v213_v17  ;;  %v2308_v17 = vpop.permute.xlu1 %2307  ;;  %vm534_vm2 = vcmp.eq.s32.totalorder %v532_v42, 0 }
 0x1aa   : > { %2728 = vcosq.f32 %v216_v2  ;;  %v300_v7 = vclz %v2520_v3  ;;  %vm331_vm4 = vcmp.eq.s32.totalorder %v326_v47, 2  ;;  %vm328_vm1 = vcmp.eq.s32.totalorder %v326_v47, 0 }
 0x1ab   : > { %2730 = vsinq.f32 %v216_v2  ;;  %vm327_vm6 = vcmp.lt.s32.totalorder %v326_v47, 2  ;;  %v2330_v3 = vsel %vm550_vm11, %v3576_v9, %v2308_v17 }
 0x1ac   : > { %v2521_v10 = vadd.s32 4294967294, %v300_v7 }
 0x1ad   : > { %v2312_v52 = vpop.permute.xlu1 %2311 }
 0x1ae   : > { %vm2522_vm12 = vcmp.lt.s32.totalorder %v2521_v10, 0 }
 0x1af   : > { %v303_v29 = vsel %vm2522_vm12, 0, %v2521_v10  ;;  %vm324_vm12 = vweird.f32 %v3891_v63 }
 0x1b0   : > { %v304_v16 = vsub.s32 32, %v303_v29  ;;  %v305_v18 = vshll.u32 %v296_v41, %v303_v29  ;;  %v308_v39 = vsub.s32 4294967266, %v303_v29 }
 0x1b2   : > { %v306_v35 = vshrl.u32 %v288_v54, %v304_v16  ;;  %v309_v33 = vadd.s32 127, %v308_v39  ;;  %v2361_v54 = vrot.slane %v2330_v3, %v4340_v20 }
 0x1b4   : > { %v2729_v45 = vpop.eup %2728  ;;  %v307_v55 = vor.u32 %v306_v35, %v305_v18  ;;  %v310_v4 = vshll.u32 %v309_v33, 23 }
 0x1b5   : > { %v2731_v15 = vpop.eup %2730  ;;  %v228_v56 = vxor.u32 2147483648, %v2729_v45 }
 0x1b6   : > { %v225_v32 = vxor.u32 2147483648, %v2731_v15  ;;  %v311_v30 = vor.u32 4788187, %v310_v4  ;;  %v314_v14 = vcvt.s32.f32 %v307_v55 }
 0x1b7   : > { %v229_v21 = vsel %vm227_vm14, %v228_v56, %v2731_v15  ;;  %v436_v24 = vsel %vm434_vm3, %v228_v56, %v2731_v15  ;;  %vm2418_vm14 = vcmask 261248  }
 0x1b8   : > { %v226_v38 = vsel %vm224_vm10, %v2729_v45, %v225_v32  ;;  %v433_v22 = vsel %vm431_vm8, %v2729_v45, %v225_v32  ;;  %v312_v11 = vand.u32 2147483647, %v311_v30  ;;  %vm533_vm8 = vcmp.lt.s32.totalorder %v532_v42, 2 }
 0x1b9   : > { %v230_v61 = vsel %vm223_vm13, %v226_v38, %v229_v21  ;;  %v437_v12 = vsel %vm430_vm9, %v433_v22, %v436_v24  ;;  %v2332_v45 = vsel %vm550_vm11, %v3671_v43, %v2312_v52  ;;  %vm2337_vm10 = vcmask 130048  }
 0x1ba   : > { %v4077_v36 = vsel %vm220_vm15, nan, %v230_v61  ;;  %v438_v50 = vsel %vm220_vm15, nan, %v437_v12  ;;  %v315_v40 = vmul.f32 %v314_v14, %v312_v11 }
 0x1bb   : > { %544 = vrot.lane.b32.xlu0 %v438_v50, %s2807_s22 }
 0x1bc   : > { %v316_v6 = vxor.u32 2147483648, %v315_v40 }
 0x1be   : > { %v317_v19 = vsel %vm234_vm0, %v316_v6, %v315_v40 }
 0x1bf   : > { %2394 = vrot.lane.b32.xlu0 %v2357_v57, %s2808_s23  ;;  %v320_v8 = vsel %vm233_vm5, %v3891_v63, %v317_v19  ;;  %v2369_v63 = vrot.slane %v2332_v45, %v4340_v20 }
 0x1c0   : > { %2732 = vcosq.f32 %v320_v8 }
 0x1c1   : > { %2734 = vsinq.f32 %v320_v8 }
 0x1c3   : > { %2398 = vrot.lane.b32.xlu0 %v2365_v60, %s2808_s23 }
 0x1ca   : > { %v2314_v23 = vpop.permute.xlu0 %2313  ;;  %v2733_v49 = vpop.eup %2732 }
 0x1cb   : > { %v2333_v27 = vsel %vm550_vm11, %v3812_v13, %v2314_v23  ;;  %v2735_v59 = vpop.eup %2734  ;;  %v332_v2 = vxor.u32 2147483648, %v2733_v49 }
 0x1cc   : > { %v2373_v5 = vrot.slane %v2333_v27, %v4340_v20  ;;  %v329_v41 = vxor.u32 2147483648, %v2735_v59 }
 0x1cd   : > { %v333_v13 = vsel %vm331_vm4, %v332_v2, %v2735_v59  ;;  %v539_v0 = vsel %vm537_vm7, %v332_v2, %v2735_v59 }
 0x1ce   : > { %2402 = vrot.lane.b32.xlu0 %v2373_v5, %s2808_s23  ;;  %v330_v58 = vsel %vm328_vm1, %v2733_v49, %v329_v41  ;;  %v536_v51 = vsel %vm534_vm2, %v2733_v49, %v329_v41 }
 0x1cf   : > { %v334_v34 = vsel %vm327_vm6, %v330_v58, %v333_v13  ;;  %v540_v7 = vsel %vm533_vm8, %v536_v51, %v539_v0 }
 0x1d0   : > { %v335_v10 = vsel %vm324_vm12, nan, %v334_v34  ;;  %v541_v44 = vsel %vm324_vm12, nan, %v540_v7 }
 0x1d1   : > { %546 = vrot.lane.b32.xlu1 %v541_v44, %s2807_s22 }
 0x1d5   : > { %2396 = vrot.lane.b32.xlu1 %v2361_v54, %s2808_s23 }
 0x1d9   : > { %2400 = vrot.lane.b32.xlu1 %v2369_v63, %s2808_s23 }
 0x1dd   : > { %v2316_v29 = vpop.permute.xlu1 %2315 }
 0x1de   : > { %v2334_v9 = vsel %vm550_vm11, %v3882_v31, %v2316_v29 }
 0x1df   : > { %v2377_v15 = vrot.slane %v2334_v9, %v4340_v20 }
 0x1e1   : > { %2404 = vrot.lane.b32.xlu1 %v2377_v15, %s2808_s23 }
 0x1f6   : > { %v2318_v56 = vpop.permute.xlu0 %2317 }
 0x1f7   : > { %v2335_v43 = vsel %vm550_vm11, %v3975_v37, %v2318_v56 }
 0x1f8   : > { %v2381_v16 = vrot.slane %v2335_v43, %v4340_v20 }
 0x1fa   : > { %2406 = vrot.lane.b32.xlu0 %v2381_v16, %s2808_s23 }
 0x20a   : > { %v2320_v18 = vpop.permute.xlu1 %2319 }
 0x20b   : > { %v2336_v39 = vsel %vm550_vm11, %v4036_v48, %v2320_v18 }
 0x20c   : > { %v2385_v31 = vrot.slane %v2336_v39, %v4340_v20 }
 0x20e   : > { %2408 = vrot.lane.b32.xlu1 %v2385_v31, %s2808_s23 }
 0x22d   : > { %v545_v32 = vpop.permute.xlu0 %544 }
 0x22e   : > { %v551_v37 = vsel %vm550_vm11, %v4077_v36, %v545_v32 }
 0x22f   : > { %2338 = vst.msk [vmem:[%s4125_s26] sm:$0xff] %vm2337_vm10, %v551_v37  ;;  %2340 = vst.msk [vmem:[%s4125_s26 + $0x10] sm:$0xff] %vm2337_vm10, %v551_v37 }
 0x230   : > { %2342 = vst.msk [vmem:[%s4125_s26 + $0x20] sm:$0xff] %vm2337_vm10, %v551_v37  ;;  %2344 = vst.msk [vmem:[%s4125_s26 + $0x30] sm:$0xff] %vm2337_vm10, %v551_v37 }
 0x231   : > { %2346 = vst.msk [vmem:[%s4125_s26 + $0x40] sm:$0xff] %vm2337_vm10, %v551_v37  ;;  %2348 = vst.msk [vmem:[%s4125_s26 + $0x50] sm:$0xff] %vm2337_vm10, %v551_v37  ;;  %v2395_v48 = vpop.permute.xlu0 %2394 }
 0x232   : > { %2350 = vst.msk [vmem:[%s4125_s26 + $0x60] sm:$0xff] %vm2337_vm10, %v551_v37  ;;  %2352 = vst.msk [vmem:[%s4125_s26 + $0x70] sm:$0xff] %vm2337_vm10, %v551_v37 }
 0x233   : > { %2419 = vst.msk [vmem:[%s4125_s26] sm:$0xff] %vm2418_vm14, %v2395_v48 }
 0x235   : > { %v2399_v21 = vpop.permute.xlu0 %2398 }
 0x236   : > { %2423 = vst.msk [vmem:[%s4125_s26 + $0x20] sm:$0xff] %vm2418_vm14, %v2399_v21 }
 0x240   : > { %v2403_v24 = vpop.permute.xlu0 %2402 }
 0x241   : > { %2427 = vst.msk [vmem:[%s4125_s26 + $0x40] sm:$0xff] %vm2418_vm14, %v2403_v24 }
 0x243   : > { %v547_v35 = vpop.permute.xlu1 %546 }
 0x244   : > { %v552_v33 = vsel %vm550_vm11, %v335_v10, %v547_v35 }
 0x245   : > { %2339 = vst.msk [vmem:[%s4125_s26 + $0x8] sm:$0xff] %vm2337_vm10, %v552_v33  ;;  %2341 = vst.msk [vmem:[%s4125_s26 + $0x18] sm:$0xff] %vm2337_vm10, %v552_v33 }
 0x246   : > { %2343 = vst.msk [vmem:[%s4125_s26 + $0x28] sm:$0xff] %vm2337_vm10, %v552_v33  ;;  %2345 = vst.msk [vmem:[%s4125_s26 + $0x38] sm:$0xff] %vm2337_vm10, %v552_v33 }
 0x247   : > { %2347 = vst.msk [vmem:[%s4125_s26 + $0x48] sm:$0xff] %vm2337_vm10, %v552_v33  ;;  %2349 = vst.msk [vmem:[%s4125_s26 + $0x58] sm:$0xff] %vm2337_vm10, %v552_v33  ;;  %v2397_v38 = vpop.permute.xlu1 %2396 }
 0x248   : > { %2351 = vst.msk [vmem:[%s4125_s26 + $0x68] sm:$0xff] %vm2337_vm10, %v552_v33  ;;  %2353 = vst.msk [vmem:[%s4125_s26 + $0x78] sm:$0xff] %vm2337_vm10, %v552_v33 }
 0x249   : > { %2420 = vst.msk [vmem:[%s4125_s26 + $0x8] sm:$0xff] %vm2418_vm14, %v2395_v48  ;;  %2424 = vst.msk [vmem:[%s4125_s26 + $0x28] sm:$0xff] %vm2418_vm14, %v2399_v21 }
 0x24a   : > { %2428 = vst.msk [vmem:[%s4125_s26 + $0x48] sm:$0xff] %vm2418_vm14, %v2403_v24  ;;  %2421 = vst.msk [vmem:[%s4125_s26 + $0x10] sm:$0xff] %vm2418_vm14, %v2397_v38 }
 0x24b   : > { %2422 = vst.msk [vmem:[%s4125_s26 + $0x18] sm:$0xff] %vm2418_vm14, %v2397_v38  ;;  %v2401_v22 = vpop.permute.xlu1 %2400 }
 0x24c   : > { %2425 = vst.msk [vmem:[%s4125_s26 + $0x30] sm:$0xff] %vm2418_vm14, %v2401_v22  ;;  %2426 = vst.msk [vmem:[%s4125_s26 + $0x38] sm:$0xff] %vm2418_vm14, %v2401_v22 }
 0x253   : > { %v2405_v26 = vpop.permute.xlu1 %2404 }
 0x254   : > { %2429 = vst.msk [vmem:[%s4125_s26 + $0x50] sm:$0xff] %vm2418_vm14, %v2405_v26  ;;  %2430 = vst.msk [vmem:[%s4125_s26 + $0x58] sm:$0xff] %vm2418_vm14, %v2405_v26 }
 0x26c   : > { %v2407_v61 = vpop.permute.xlu0 %2406 }
 0x26d   : > { %2431 = vst.msk [vmem:[%s4125_s26 + $0x60] sm:$0xff] %vm2418_vm14, %v2407_v61  ;;  %2432 = vst.msk [vmem:[%s4125_s26 + $0x68] sm:$0xff] %vm2418_vm14, %v2407_v61 }
 0x280   : > { %v2409_v12 = vpop.permute.xlu1 %2408 }
 0x281   : > { %2433 = vst.msk [vmem:[%s4125_s26 + $0x70] sm:$0xff] %vm2418_vm14, %v2409_v12  ;;  %2434 = vst.msk [vmem:[%s4125_s26 + $0x78] sm:$0xff] %vm2418_vm14, %v2409_v12 }
 0x282   : > { %2749 = shalt.err (!%p2746_p3)
}
 0x283   : > { %s2750_s13 = scalar_lea.hbm %s4193_s2, 2048  ;;  %s2754_s19 = scalar_lea.hbm %s4246_s1, 4096 }
 0x284   : > { %p2751_p4 = scmp.ne.s32.totalorder %s4193_s2, %s2750_s13  ;;  %p2755_p9 = scmp.lt.u32.totalorder %s4193_s2, %s4246_s1 }
 0x285   : > { %p2756_p10 = scmp.lt.u32.totalorder %s2754_s19, %s2750_s13  ;;  %p2758_p12 = scmp.lt.u32.totalorder %s2750_s13, %s4193_s2 }
 0x286   : > { %p2752_p7 = pnand %p2751_p4, %p2859_p5 }
 0x287   : > { %p2757_p11 = por %p2756_p10, %p2755_p9 }
 0x288   : > { %p2753_p8 = pneg %p2752_p7 }
 0x289   : > { %p2759_p13 = por %p2758_p12, %p2757_p11 }
 0x28b   : > { %p2760_p0 = pnand %p2759_p13, %p2753_p8 }
 0x28d   : > { %2763 = shalt.err (!%p2760_p0)
}
 0x28e   : > { %s2810_s23 = smov 128  }
 0x28f   : > { %2643 = dma.vmem_to_hbm [thread:$0]  (%p2859_p5), %s4195_s28, 2048, %s4193_s2, %s4203_s3, %s2810_s23, %s2810_s23, %s2807_s22  }
 0x290 PF: > { %p2649_p1 = scmp.ge.s32.totalorder %s2798_s9, 2  ;;  %s2465_s24 = sand.u32 1, %s2786_s6  }
 0x291   : > { %s2466_s25 = scalar_lea.sflag [#allocation3], %s2465_s24 }
 0x292   : > { %p2646_p2 = pnand %p2649_p1, %p2863_p6 }
 0x294   : > { %2781 = dma.done.wait (!%p2646_p2), %s2466_s25, 2048  }
 0x295   : > { %2783 = vsyncadd (!%p2646_p2), %s2466_s25, 4294965248  ;;  %p11_p3 = scmp.ge.s32.totalorder %s2846_s12, 4   ;;  %s4341_s6 = smov %s2790_s7 }
 0x296   : > { %s4342_s7 = smov %s2794_s8  ;;  %s4343_s8 = smov %s2857_s15 }
 0x297   : > { %s4344_s9 = smov %s2846_s12  ;;  %13 = sbr.rel (!%p11_p3) target bundleno = 3 (0x3), region = 59 }
 0x29e   :  { %2471 = vsyncpa [#allocation3], 1 }
 0x29f   :  { %2473 = vsyncpa [#allocation3 + $0x1], 1 }

</bundles_post_ra>
